<compile_context>
chip_gen: v6e
topology: v6e:2x2x1
jax: 0.10.0
libtpu: 0.0.40
codegen_flags: <defaults>
</compile_context>

<pallas_src>
import functools

import jax
import jax.numpy as jnp
from jax.experimental import pallas as pl
from jax.experimental.pallas import tpu as pltpu

K = 9            # conv kernel width (1, 9)
PAD = 4          # padding (0, 4)
EPS = 1e-5       # BatchNorm eps
LANE = 128       # TPU lane width
TARGET_ROWS = 4096                 # matmul rows (tile_m * W_out) per grid step
VMEM_BUDGET = 32 * 1024 * 1024     # per-tile working-set budget (safe on v7x's 64 MiB)
VMEM_LIMIT_CAP = 48 * 1024 * 1024  # scoped-VMEM request cap


def basic_block_kernel(x_ref, w1_ref, w2_ref, wsc_ref, b1_ref, b2sc_ref,
                       out_ref, hpad_ref, *, stride):
    # x_ref:    (tile_M, stride, W_phase, Cin)   bf16, stride-de-interleaved padded input
    # w1_ref:   (K*Cin, Cout_p)        bf16 (BN1 folded)
    # w2_ref:   (K*Cout_p, Cout_p)     bf16 (BN2 folded, tap-major rows)
    # wsc_ref:  (Cin, Cout_p)          bf16 (BN_sc folded)
    # b1_ref:   (1, Cout_p) f32 ; b2sc_ref: (1, Cout_p) f32  (= b2 + bsc)
    # out_ref:  (tile_M, W_out, Cout_p) bf16
    # hpad_ref: (tile_M, W_out + 2*PAD, Cout_p) bf16 scratch
    tile_m, _, _, cin = x_ref.shape
    _, w_out, cout = out_ref.shape
    rows = tile_m * w_out

    xv = x_ref[...]                                   # (tile_m, s, W_phase, Cin) bf16

    # ---- conv1 (1x9, stride) + BN1 + ReLU as ONE deep matmul over K*Cin ----
    # tap k of output j reads padded width index j*stride + k, i.e. phase k%stride,
    # offset k//stride + j in the de-interleaved layout -> contiguous slices only.
    # (For tiny Cin the lane-unaligned concat is relayout-bound, not MXU-bound; acceptable.)
    taps = [xv[:, k % stride, k // stride:k // stride + w_out, :] for k in range(K)]
    im1 = jnp.concatenate(taps, axis=-1).reshape(rows, K * cin)
    h = jnp.dot(im1, w1_ref[...], preferred_element_type=jnp.float32)
    h = jnp.maximum(h + b1_ref[...], 0.0)
    h = h.reshape(tile_m, w_out, cout).astype(hpad_ref.dtype)

    # stage h zero-padded along width; zero ONLY the 2*PAD pad columns (per iteration:
    # scratch is per-core under the parallel megacore split).
    hpad_ref[:, 0:PAD, :] = jnp.zeros((tile_m, PAD, cout), hpad_ref.dtype)
    hpad_ref[:, PAD + w_out:2 * PAD + w_out, :] = jnp.zeros((tile_m, PAD, cout),
                                                            hpad_ref.dtype)
    hpad_ref[:, PAD:PAD + w_out, :] = h

    # ---- shortcut (1x1 conv, stride) + BN, fused into the conv2 accumulator ----
    # shortcut output j reads padded width index PAD + j*stride
    x_sc = xv[:, PAD % stride, PAD // stride:PAD // stride + w_out, :]
    acc = jnp.dot(x_sc.reshape(rows, cin), wsc_ref[...],
                  preferred_element_type=jnp.float32) + b2sc_ref[...]

    # ---- conv2 (1x9, stride 1) + BN2 as ONE deep matmul over K*Cout_p ----
    # each concat chunk is a multiple of 128 lanes -> lane-aligned concat, single MXU dot
    hv = hpad_ref[...]
    im2 = jnp.concatenate([hv[:, k:k + w_out, :] for k in range(K)],
                          axis=-1).reshape(rows, K * cout)
    acc = acc + jnp.dot(im2, w2_ref[...], preferred_element_type=jnp.float32)

    # ---- residual ReLU, bf16 writeback ----
    out_ref[...] = jnp.maximum(acc, 0.0).reshape(tile_m, w_out, cout).astype(out_ref.dtype)


def fold_bn(w, gamma, beta, mean, var):
    # Inference-mode BatchNorm folded into the preceding bias-free conv (f32).
    scale = gamma / jnp.sqrt(var + EPS)
    w_f = w * scale[:, None, None, None]
    b_f = beta - mean * scale
    return w_f, b_f


def _vmem_bytes(tile_m, stride, w_phase, w_out, cin, cout_p):
    # Conservative per-tile VMEM estimate: double-buffered x/out blocks, hpad scratch,
    # weights (budgeted 2x), and in-kernel im2col / accumulator temporaries.
    bf16, f32 = 2, 4
    rows = tile_m * w_out
    x_blk = tile_m * stride * w_phase * cin * bf16
    out_blk = tile_m * w_out * cout_p * bf16
    hpad = tile_m * (w_out + 2 * PAD) * cout_p * bf16
    weights = (K * cin * cout_p + K * cout_p * cout_p + cin * cout_p) * bf16 \
        + 2 * cout_p * f32
    temps = rows * (K * cin + K * cout_p + cout_p) * bf16 + rows * cout_p * f32
    return 2 * x_blk + 2 * out_blk + hpad + 2 * weights + temps


def basic_block_forward(x, params, stride=1, channels_last_out=False):
    # x: NCHW float32
    N, Cin, H, W = x.shape
    w1f, b1 = fold_bn(params["w1"], params["g1"], params["be1"], params["m1"], params["v1"])
    w2f, b2 = fold_bn(params["w2"], params["g2"], params["be2"], params["m2"], params["v2"])
    wscf, bsc = fold_bn(params["wsc"], params["gsc"], params["besc"], params["msc"], params["vsc"])
    Cout = w1f.shape[0]
    Cout_p = ((Cout + LANE - 1) // LANE) * LANE          # lane-dense output channels

    W_out = (W + 2 * PAD - K) // stride + 1
    W_phase = W_out + (K - 1) // stride
    M = N * H

    # channels-last rows, bf16 for the MXU (accumulation stays f32 inside the kernel)
    x_rows = jnp.transpose(x, (0, 2, 3, 1)).reshape(M, W, Cin).astype(jnp.bfloat16)
    L = W_phase * stride                                  # >= covered tap range
    x_pad = jnp.pad(x_rows, ((0, 0), (PAD, L - W - PAD), (0, 0)))
    # de-interleave the width into `stride` phases so every in-kernel tap is a contiguous
    # (unit-stride) slice:  x_ph[m, p, q, c] == x_pad[m, q*stride + p, c]
    if stride == 1:
        x_ph = x_pad.reshape(M, 1, W_phase, Cin)          # pure reshape, no extra HBM pass
    else:
        x_ph = jnp.transpose(x_pad.reshape(M, W_phase, stride, Cin), (0, 2, 1, 3))

    def pad_cout(a):  # pad last axis (output channels) up to Cout_p
        return jnp.pad(a, ((0, 0),) * (a.ndim - 1) + ((0, Cout_p - Cout),))

    # conv1 weight as one deep (K*Cin, Cout_p) matmul operand (tap-major, channel-minor)
    w1m = pad_cout(jnp.transpose(w1f[:, :, 0, :], (2, 1, 0)).reshape(K * Cin, Cout)
                   ).astype(jnp.bfloat16)
    # conv2 weight as one deep (K*Cout_p, Cout_p) matmul operand (tap-major rows)
    w2k = jnp.transpose(w2f[:, :, 0, :], (2, 1, 0))                      # (K, Cout, Cout)
    w2k = jnp.pad(w2k, ((0, 0), (0, Cout_p - Cout), (0, Cout_p - Cout)))
    w2m = w2k.reshape(K * Cout_p, Cout_p).astype(jnp.bfloat16)
    # shortcut 1x1 weight (Cin, Cout_p)
    wscm = pad_cout(jnp.transpose(wscf[:, :, 0, 0], (1, 0))).astype(jnp.bfloat16)
    # folded biases (f32); shortcut bias fused with b2
    b1p = pad_cout(b1.reshape(1, Cout)).astype(jnp.float32)
    b2scp = pad_cout((b2 + bsc).reshape(1, Cout)).astype(jnp.float32)

    # ---- row tiling: ~TARGET_ROWS matmul rows per step, VMEM-bounded, >=2 grid steps ----
    tile_m = max(1, TARGET_ROWS // max(1, W_out))
    if M >= 2:
        tile_m = min(tile_m, pl.cdiv(M, 2))     # keep >=2 steps for megacore / v7x 2 TCs
    while tile_m > 1 and _vmem_bytes(tile_m, stride, W_phase, W_out, Cin, Cout_p) > VMEM_BUDGET:
        tile_m = pl.cdiv(tile_m, 2)
    M_pad = pl.cdiv(M, tile_m) * tile_m
    grid = (M_pad // tile_m,)
    if M_pad > M:
        x_ph = jnp.pad(x_ph, ((0, M_pad - M), (0, 0), (0, 0), (0, 0)))

    est = _vmem_bytes(tile_m, stride, W_phase, W_out, Cin, Cout_p)
    vmem_limit = max(32 * 1024 * 1024, min(2 * est, VMEM_LIMIT_CAP), est + (4 << 20))

    out = pl.pallas_call(
        functools.partial(basic_block_kernel, stride=stride),
        out_shape=jax.ShapeDtypeStruct((M_pad, W_out, Cout_p), jnp.bfloat16),
        grid_spec=pltpu.PrefetchScalarGridSpec(
            num_scalar_prefetch=0,
            grid=grid,
            in_specs=[
                pl.BlockSpec((tile_m, stride, W_phase, Cin), lambda i: (i, 0, 0, 0)),
                pl.BlockSpec((K * Cin, Cout_p), lambda i: (0, 0)),       # resident weights
                pl.BlockSpec((K * Cout_p, Cout_p), lambda i: (0, 0)),
                pl.BlockSpec((Cin, Cout_p), lambda i: (0, 0)),
                pl.BlockSpec((1, Cout_p), lambda i: (0, 0)),
                pl.BlockSpec((1, Cout_p), lambda i: (0, 0)),
            ],
            out_specs=pl.BlockSpec((tile_m, W_out, Cout_p), lambda i: (i, 0, 0)),
            scratch_shapes=[pltpu.VMEM((tile_m, W_out + 2 * PAD, Cout_p), jnp.bfloat16)],
        ),
        compiler_params=pltpu.CompilerParams(
            dimension_semantics=("parallel",),
            vmem_limit_bytes=int(vmem_limit)),
    )(x_ph, w1m, w2m, wscm, b1p, b2scp)

    out = out[:M]                                          # drop row padding
    if channels_last_out:
        return out                                         # (M, W_out, Cout_p) bf16 slab
    out = out[:, :, :Cout].astype(jnp.float32).reshape(N, H, W_out, Cout)
    return jnp.transpose(out, (0, 3, 1, 2))                # back to NCHW


def basic_block_reference(x, params, stride=1):
    # Pure-JAX f32 reference (eval-mode BN), for correctness checking only.
    def conv(x, w, sw, pw):
        return jax.lax.conv_general_dilated(
            x, w, window_strides=(1, sw), padding=((0, 0), (pw, pw)),
            dimension_numbers=("NCHW", "OIHW", "NCHW"))

    def bn(x, g, b, m, v):
        s = (g / jnp.sqrt(v + EPS))
        return (x - m[None, :, None, None]) * s[None, :, None, None] + b[None, :, None, None]

    h = jnp.maximum(bn(conv(x, params["w1"], stride, PAD),
                       params["g1"], params["be1"], params["m1"], params["v1"]), 0.0)
    h = bn(conv(h, params["w2"], 1, PAD),
           params["g2"], params["be2"], params["m2"], params["v2"])
    s = bn(conv(x, params["wsc"], stride, 0),
           params["gsc"], params["besc"], params["msc"], params["vsc"])
    return jnp.maximum(h + s, 0.0)


def init_params(key, in_planes, planes):
    ks = jax.random.split(key, 15)
    f32 = jnp.float32
    return {
        "w1": 0.1 * jax.random.normal(ks[0], (planes, in_planes, 1, K), f32),
        "g1": 1.0 + 0.1 * jax.random.normal(ks[1], (planes,), f32),
        "be1": 0.1 * jax.random.normal(ks[2], (planes,), f32),
        "m1": 0.1 * jax.random.normal(ks[3], (planes,), f32),
        "v1": 1.0 + 0.5 * jax.random.uniform(ks[4], (planes,), f32),
        "w2": 0.1 * jax.random.normal(ks[5], (planes, planes, 1, K), f32),
        "g2": 1.0 + 0.1 * jax.random.normal(ks[6], (planes,), f32),
        "be2": 0.1 * jax.random.normal(ks[7], (planes,), f32),
        "m2": 0.1 * jax.random.normal(ks[8], (planes,), f32),
        "v2": 1.0 + 0.5 * jax.random.uniform(ks[9], (planes,), f32),
        "wsc": 0.1 * jax.random.normal(ks[10], (planes, in_planes, 1, 1), f32),
        "gsc": 1.0 + 0.1 * jax.random.normal(ks[11], (planes,), f32),
        "besc": 0.1 * jax.random.normal(ks[12], (planes,), f32),
        "msc": 0.1 * jax.random.normal(ks[13], (planes,), f32),
        "vsc": 1.0 + 0.5 * jax.random.uniform(ks[14], (planes,), f32),
    }


if __name__ == "__main__":
    key = jax.random.PRNGKey(0)
    k_x, k_p = jax.random.split(key)

    N, in_planes, planes, H, W = 2, 4, 8, 4, 16
    x = jax.random.normal(k_x, (N, in_planes, H, W), jnp.float32)
    params = init_params(k_p, in_planes, planes)

    for stride in (1, 2):
        out = jax.block_until_ready(basic_block_forward(x, params, stride=stride))
        ref = jax.block_until_ready(basic_block_reference(x, params, stride=stride))
        assert out.shape == ref.shape, (out.shape, ref.shape)
        # bf16 matmul inputs + bf16 writeback with f32 accumulation -> looser tolerance
        assert jnp.allclose(out, ref, atol=6e-2, rtol=6e-2), (
            stride, float(jnp.max(jnp.abs(out - ref))))

    print("KERNEL_OK")
</pallas_src>

<mosaic_0001>
module attributes {stable_mosaic.version = 11 : i64} {
  func.func @basic_block_kernel(%arg0: i32, %arg1: memref<4x1x24x4xbf16, #tpu.memory_space<vmem>>, %arg2: memref<36x128xbf16, #tpu.memory_space<vmem>>, %arg3: memref<1152x128xbf16, #tpu.memory_space<vmem>>, %arg4: memref<4x128xbf16, #tpu.memory_space<vmem>>, %arg5: memref<1x128xf32, #tpu.memory_space<vmem>>, %arg6: memref<1x128xf32, #tpu.memory_space<vmem>>, %arg7: memref<4x16x128xbf16, #tpu.memory_space<vmem>>, %arg8: memref<4x24x128xbf16, #tpu.memory_space<vmem>>) attributes {dimension_semantics = [#tpu.dimension_semantics<parallel>], iteration_bounds = array<i64: 2>, scalar_prefetch = 0 : i64, scratch_operands = 1 : i64, tpu.core_type = #tpu.core_type<tc>, window_params = [{transform_indices = @transform_0, window_bounds = array<i64: 4, 1, 24, 4>}, {pipeline_mode = #tpu.pipeline_mode<synchronous>, transform_indices = @transform_1, window_bounds = array<i64: 36, 128>}, {pipeline_mode = #tpu.pipeline_mode<synchronous>, transform_indices = @transform_2, window_bounds = array<i64: 1152, 128>}, {pipeline_mode = #tpu.pipeline_mode<synchronous>, transform_indices = @transform_3, window_bounds = array<i64: 4, 128>}, {pipeline_mode = #tpu.pipeline_mode<synchronous>, transform_indices = @transform_4, window_bounds = array<i64: 1, 128>}, {pipeline_mode = #tpu.pipeline_mode<synchronous>, transform_indices = @transform_5, window_bounds = array<i64: 1, 128>}, {transform_indices = @transform_6, window_bounds = array<i64: 4, 16, 128>}]} {
    %c0 = arith.constant 0 : index
    %c0_0 = arith.constant 0 : index
    %c0_1 = arith.constant 0 : index
    %c0_2 = arith.constant 0 : index
    %0 = vector.load %arg1[%c0, %c0_0, %c0_1, %c0_2] : memref<4x1x24x4xbf16, #tpu.memory_space<vmem>>, vector<4x1x24x4xbf16>
    %1 = vector.extract_strided_slice %0 {offsets = [0, 0, 0, 0], sizes = [4, 1, 16, 4], strides = [1, 1, 1, 1]} : vector<4x1x24x4xbf16> to vector<4x1x16x4xbf16>
    %2 = vector.shape_cast %1 : vector<4x1x16x4xbf16> to vector<4x16x4xbf16>
    %3 = vector.extract_strided_slice %0 {offsets = [0, 0, 1, 0], sizes = [4, 1, 16, 4], strides = [1, 1, 1, 1]} : vector<4x1x24x4xbf16> to vector<4x1x16x4xbf16>
    %4 = vector.shape_cast %3 : vector<4x1x16x4xbf16> to vector<4x16x4xbf16>
    %5 = vector.extract_strided_slice %0 {offsets = [0, 0, 2, 0], sizes = [4, 1, 16, 4], strides = [1, 1, 1, 1]} : vector<4x1x24x4xbf16> to vector<4x1x16x4xbf16>
    %6 = vector.shape_cast %5 : vector<4x1x16x4xbf16> to vector<4x16x4xbf16>
    %7 = vector.extract_strided_slice %0 {offsets = [0, 0, 3, 0], sizes = [4, 1, 16, 4], strides = [1, 1, 1, 1]} : vector<4x1x24x4xbf16> to vector<4x1x16x4xbf16>
    %8 = vector.shape_cast %7 : vector<4x1x16x4xbf16> to vector<4x16x4xbf16>
    %9 = vector.extract_strided_slice %0 {offsets = [0, 0, 4, 0], sizes = [4, 1, 16, 4], strides = [1, 1, 1, 1]} : vector<4x1x24x4xbf16> to vector<4x1x16x4xbf16>
    %10 = vector.shape_cast %9 : vector<4x1x16x4xbf16> to vector<4x16x4xbf16>
    %11 = vector.extract_strided_slice %0 {offsets = [0, 0, 5, 0], sizes = [4, 1, 16, 4], strides = [1, 1, 1, 1]} : vector<4x1x24x4xbf16> to vector<4x1x16x4xbf16>
    %12 = vector.shape_cast %11 : vector<4x1x16x4xbf16> to vector<4x16x4xbf16>
    %13 = vector.extract_strided_slice %0 {offsets = [0, 0, 6, 0], sizes = [4, 1, 16, 4], strides = [1, 1, 1, 1]} : vector<4x1x24x4xbf16> to vector<4x1x16x4xbf16>
    %14 = vector.shape_cast %13 : vector<4x1x16x4xbf16> to vector<4x16x4xbf16>
    %15 = vector.extract_strided_slice %0 {offsets = [0, 0, 7, 0], sizes = [4, 1, 16, 4], strides = [1, 1, 1, 1]} : vector<4x1x24x4xbf16> to vector<4x1x16x4xbf16>
    %16 = vector.shape_cast %15 : vector<4x1x16x4xbf16> to vector<4x16x4xbf16>
    %17 = vector.extract_strided_slice %0 {offsets = [0, 0, 8, 0], sizes = [4, 1, 16, 4], strides = [1, 1, 1, 1]} : vector<4x1x24x4xbf16> to vector<4x1x16x4xbf16>
    %18 = vector.shape_cast %17 : vector<4x1x16x4xbf16> to vector<4x16x4xbf16>
    %19 = tpu.concatenate %2, %4, %6, %8, %10, %12, %14, %16, %18 in 2 : vector<4x16x4xbf16>, vector<4x16x4xbf16>, vector<4x16x4xbf16>, vector<4x16x4xbf16>, vector<4x16x4xbf16>, vector<4x16x4xbf16>, vector<4x16x4xbf16>, vector<4x16x4xbf16>, vector<4x16x4xbf16> -> vector<4x16x36xbf16>
    %20 = vector.shape_cast %19 : vector<4x16x36xbf16> to vector<64x36xbf16>
    %c0_3 = arith.constant 0 : index
    %c0_4 = arith.constant 0 : index
    %21 = vector.load %arg2[%c0_3, %c0_4] : memref<36x128xbf16, #tpu.memory_space<vmem>>, vector<36x128xbf16>
    %cst = arith.constant dense<0.000000e+00> : vector<64x128xf32>
    %22 = tpu.matmul %20, %21, %cst {dimension_numbers = #tpu.dot_dimension_numbers<[1], [0], [0], [1], [0, 0, 1, 1], [], []>} : vector<64x36xbf16>, vector<36x128xbf16>, vector<64x128xf32> -> vector<64x128xf32>
    %c0_5 = arith.constant 0 : index
    %c0_6 = arith.constant 0 : index
    %23 = vector.load %arg5[%c0_5, %c0_6] : memref<1x128xf32, #tpu.memory_space<vmem>>, vector<1x128xf32>
    %24 = vector.broadcast %23 : vector<1x128xf32> to vector<64x128xf32>
    %25 = arith.addf %22, %24 : vector<64x128xf32>
    %cst_7 = arith.constant 0.000000e+00 : f32
    %26 = vector.broadcast %cst_7 : f32 to vector<64x128xf32>
    %27 = arith.maximumf %25, %26 : vector<64x128xf32>
    %28 = vector.shape_cast %27 : vector<64x128xf32> to vector<4x16x128xf32>
    %29 = arith.truncf %28 : vector<4x16x128xf32> to vector<4x16x128xbf16>
    %cst_8 = arith.constant 0.000000e+00 : bf16
    %30 = vector.broadcast %cst_8 : bf16 to vector<4x4x128xbf16>
    %c0_9 = arith.constant 0 : index
    %c0_10 = arith.constant 0 : index
    %c0_11 = arith.constant 0 : index
    %31 = vector.load %arg8[%c0_9, %c0_10, %c0_11] : memref<4x24x128xbf16, #tpu.memory_space<vmem>>, vector<4x4x128xbf16>
    tpu.vector_store %arg8[%c0_9, %c0_10, %c0_11], %30 {strides = array<i32>} : memref<4x24x128xbf16, #tpu.memory_space<vmem>>, vector<4x4x128xbf16>,
    %cst_12 = arith.constant 0.000000e+00 : bf16
    %32 = vector.broadcast %cst_12 : bf16 to vector<4x4x128xbf16>
    %c0_13 = arith.constant 0 : index
    %c20 = arith.constant 20 : index
    %c0_14 = arith.constant 0 : index
    %33 = vector.load %arg8[%c0_13, %c20, %c0_14] : memref<4x24x128xbf16, #tpu.memory_space<vmem>>, vector<4x4x128xbf16>
    tpu.vector_store %arg8[%c0_13, %c20, %c0_14], %32 {strides = array<i32>} : memref<4x24x128xbf16, #tpu.memory_space<vmem>>, vector<4x4x128xbf16>,
    %c0_15 = arith.constant 0 : index
    %c4 = arith.constant 4 : index
    %c0_16 = arith.constant 0 : index
    %34 = vector.load %arg8[%c0_15, %c4, %c0_16] : memref<4x24x128xbf16, #tpu.memory_space<vmem>>, vector<4x16x128xbf16>
    tpu.vector_store %arg8[%c0_15, %c4, %c0_16], %29 {strides = array<i32>} : memref<4x24x128xbf16, #tpu.memory_space<vmem>>, vector<4x16x128xbf16>,
    %35 = vector.extract_strided_slice %0 {offsets = [0, 0, 4, 0], sizes = [4, 1, 16, 4], strides = [1, 1, 1, 1]} : vector<4x1x24x4xbf16> to vector<4x1x16x4xbf16>
    %36 = vector.shape_cast %35 : vector<4x1x16x4xbf16> to vector<4x16x4xbf16>
    %37 = vector.shape_cast %36 : vector<4x16x4xbf16> to vector<64x4xbf16>
    %c0_17 = arith.constant 0 : index
    %c0_18 = arith.constant 0 : index
    %38 = vector.load %arg4[%c0_17, %c0_18] : memref<4x128xbf16, #tpu.memory_space<vmem>>, vector<4x128xbf16>
    %cst_19 = arith.constant dense<0.000000e+00> : vector<64x128xf32>
    %39 = tpu.matmul %37, %38, %cst_19 {dimension_numbers = #tpu.dot_dimension_numbers<[1], [0], [0], [1], [0, 0, 1, 1], [], []>} : vector<64x4xbf16>, vector<4x128xbf16>, vector<64x128xf32> -> vector<64x128xf32>
    %c0_20 = arith.constant 0 : index
    %c0_21 = arith.constant 0 : index
    %40 = vector.load %arg6[%c0_20, %c0_21] : memref<1x128xf32, #tpu.memory_space<vmem>>, vector<1x128xf32>
    %41 = vector.broadcast %40 : vector<1x128xf32> to vector<64x128xf32>
    %42 = arith.addf %39, %41 : vector<64x128xf32>
    %c0_22 = arith.constant 0 : index
    %c0_23 = arith.constant 0 : index
    %c0_24 = arith.constant 0 : index
    %43 = vector.load %arg8[%c0_22, %c0_23, %c0_24] : memref<4x24x128xbf16, #tpu.memory_space<vmem>>, vector<4x24x128xbf16>
    %44 = vector.extract_strided_slice %43 {offsets = [0, 0, 0], sizes = [4, 16, 128], strides = [1, 1, 1]} : vector<4x24x128xbf16> to vector<4x16x128xbf16>
    %45 = vector.extract_strided_slice %43 {offsets = [0, 1, 0], sizes = [4, 16, 128], strides = [1, 1, 1]} : vector<4x24x128xbf16> to vector<4x16x128xbf16>
    %46 = vector.extract_strided_slice %43 {offsets = [0, 2, 0], sizes = [4, 16, 128], strides = [1, 1, 1]} : vector<4x24x128xbf16> to vector<4x16x128xbf16>
    %47 = vector.extract_strided_slice %43 {offsets = [0, 3, 0], sizes = [4, 16, 128], strides = [1, 1, 1]} : vector<4x24x128xbf16> to vector<4x16x128xbf16>
    %48 = vector.extract_strided_slice %43 {offsets = [0, 4, 0], sizes = [4, 16, 128], strides = [1, 1, 1]} : vector<4x24x128xbf16> to vector<4x16x128xbf16>
    %49 = vector.extract_strided_slice %43 {offsets = [0, 5, 0], sizes = [4, 16, 128], strides = [1, 1, 1]} : vector<4x24x128xbf16> to vector<4x16x128xbf16>
    %50 = vector.extract_strided_slice %43 {offsets = [0, 6, 0], sizes = [4, 16, 128], strides = [1, 1, 1]} : vector<4x24x128xbf16> to vector<4x16x128xbf16>
    %51 = vector.extract_strided_slice %43 {offsets = [0, 7, 0], sizes = [4, 16, 128], strides = [1, 1, 1]} : vector<4x24x128xbf16> to vector<4x16x128xbf16>
    %52 = vector.extract_strided_slice %43 {offsets = [0, 8, 0], sizes = [4, 16, 128], strides = [1, 1, 1]} : vector<4x24x128xbf16> to vector<4x16x128xbf16>
    %53 = tpu.concatenate %44, %45, %46, %47, %48, %49, %50, %51, %52 in 2 : vector<4x16x128xbf16>, vector<4x16x128xbf16>, vector<4x16x128xbf16>, vector<4x16x128xbf16>, vector<4x16x128xbf16>, vector<4x16x128xbf16>, vector<4x16x128xbf16>, vector<4x16x128xbf16>, vector<4x16x128xbf16> -> vector<4x16x1152xbf16>
    %54 = vector.shape_cast %53 : vector<4x16x1152xbf16> to vector<64x1152xbf16>
    %c0_25 = arith.constant 0 : index
    %c0_26 = arith.constant 0 : index
    %55 = vector.load %arg3[%c0_25, %c0_26] : memref<1152x128xbf16, #tpu.memory_space<vmem>>, vector<1152x128xbf16>
    %cst_27 = arith.constant dense<0.000000e+00> : vector<64x128xf32>
    %56 = tpu.matmul %54, %55, %cst_27 {dimension_numbers = #tpu.dot_dimension_numbers<[1], [0], [0], [1], [0, 0, 1, 1], [], []>} : vector<64x1152xbf16>, vector<1152x128xbf16>, vector<64x128xf32> -> vector<64x128xf32>
    %57 = arith.addf %42, %56 : vector<64x128xf32>
    %cst_28 = arith.constant 0.000000e+00 : f32
    %58 = vector.broadcast %cst_28 : f32 to vector<64x128xf32>
    %59 = arith.maximumf %57, %58 : vector<64x128xf32>
    %60 = vector.shape_cast %59 : vector<64x128xf32> to vector<4x16x128xf32>
    %61 = arith.truncf %60 : vector<4x16x128xf32> to vector<4x16x128xbf16>
    %c0_29 = arith.constant 0 : index
    %c0_30 = arith.constant 0 : index
    %c0_31 = arith.constant 0 : index
    %62 = vector.load %arg7[%c0_29, %c0_30, %c0_31] : memref<4x16x128xbf16, #tpu.memory_space<vmem>>, vector<4x16x128xbf16>
    tpu.vector_store %arg7[%c0_29, %c0_30, %c0_31], %61 {strides = array<i32>} : memref<4x16x128xbf16, #tpu.memory_space<vmem>>, vector<4x16x128xbf16>,
    return
  }
  func.func @transform_0(%arg0: i32) -> (i32, i32, i32, i32) {
    %c0_i32 = arith.constant 0 : i32
    %c0_i32_0 = arith.constant 0 : i32
    %c0_i32_1 = arith.constant 0 : i32
    %c0_i32_2 = arith.constant 0 : i32
    return %arg0, %c0_i32, %c0_i32_0, %c0_i32_1 : i32, i32, i32, i32
  }
  func.func @transform_1(%arg0: i32) -> (i32, i32) {
    %c0_i32 = arith.constant 0 : i32
    %c0_i32_0 = arith.constant 0 : i32
    %c0_i32_1 = arith.constant 0 : i32
    return %c0_i32, %c0_i32_0 : i32, i32
  }
  func.func @transform_2(%arg0: i32) -> (i32, i32) {
    %c0_i32 = arith.constant 0 : i32
    %c0_i32_0 = arith.constant 0 : i32
    %c0_i32_1 = arith.constant 0 : i32
    return %c0_i32, %c0_i32_0 : i32, i32
  }
  func.func @transform_3(%arg0: i32) -> (i32, i32) {
    %c0_i32 = arith.constant 0 : i32
    %c0_i32_0 = arith.constant 0 : i32
    %c0_i32_1 = arith.constant 0 : i32
    return %c0_i32, %c0_i32_0 : i32, i32
  }
  func.func @transform_4(%arg0: i32) -> (i32, i32) {
    %c0_i32 = arith.constant 0 : i32
    %c0_i32_0 = arith.constant 0 : i32
    %c0_i32_1 = arith.constant 0 : i32
    return %c0_i32, %c0_i32_0 : i32, i32
  }
  func.func @transform_5(%arg0: i32) -> (i32, i32) {
    %c0_i32 = arith.constant 0 : i32
    %c0_i32_0 = arith.constant 0 : i32
    %c0_i32_1 = arith.constant 0 : i32
    return %c0_i32, %c0_i32_0 : i32, i32
  }
  func.func @transform_6(%arg0: i32) -> (i32, i32, i32) {
    %c0_i32 = arith.constant 0 : i32
    %c0_i32_0 = arith.constant 0 : i32
    %c0_i32_1 = arith.constant 0 : i32
    return %arg0, %c0_i32, %c0_i32_0 : i32, i32, i32
  }
}

</mosaic_0001>

<bundles_post_ra>
// kernel: tpu_custom_call.1
= control target key start
LH: loop header
LB: loop body
LE: loop exit
PB: predicated region body
PF: predicated region fallthrough
CT: control target
= control target key end

     0   :  { %11 = vsyncpa [#allocation4], 0  ;;  %s3817_s0 = inlined_call_operand.vmem [shape: bf16[8,1,24,4], index: 0, kind: input, shape index: {}]   ;;  %s3818_s1 = inlined_call_operand.vmem [shape: bf16[36,128], index: 1, kind: input, shape index: {}]   ;;  %s3819_s2 = inlined_call_operand.hbm [shape: bf16[1152,128], index: 2, kind: input, shape index: {}]   ;;  %s3820_s3 = inlined_call_operand.vmem [shape: bf16[4,128], index: 3, kind: input, shape index: {}]   ;;  %s3821_s4 = inlined_call_operand.vmem [shape: f32[1,128], index: 4, kind: input, shape index: {}]   ;;  %s3822_s5 = inlined_call_operand.vmem [shape: f32[1,128], index: 5, kind: input, shape index: {}]   ;;  %s3823_s6 = inlined_call_operand.hbm [shape: bf16[8,16,128], index: 6, kind: output, shape index: {}]  }
   0x1   :  { %12 = vsyncpa [#allocation5], 0 }
   0x2   :  { %14 = vsyncpa [#allocation5 + $0x1], 0  ;;  %s2990_s21 = smov 0   ;;  %s2992_s22 = smov 0  }
   0x3   :  { %s2994_s23 = smov 0   ;;  %s2996_s24 = smov 0  }
   0x4 LB: > { %s3011_s25 = sadd.s32 4294967295, %s2939_s24   ;;  %s2265_s26 = sadd.s32 4294967294, %s2939_s24   ;;  %s2939_s24 = sphi %s2996_s24, %s3864_s24   ;;  %s2935_s23 = sphi %s2994_s23, %s3863_s23   ;;  %s2931_s22 = sphi %s2992_s22, %s3862_s22   ;;  %s2927_s21 = sphi %s2990_s21, %s3861_s21  }
   0x5   : > { %s3015_s27 = sadd.s32 1, %s2939_s24   ;;  %s158_s28 = sadd.s32 1, %s2935_s23 }
   0x6   : > { %s155_s29 = ssub.s32 %s2939_s24, %s3015_s27  ;;  %p168_p0 = scmp.ne.s32.totalorder %s2935_s23, %s2931_s22 }
   0x7   : > { %p156_p1 = scmp.eq.s32.totalorder %s155_s29, 0  ;;  %p169_p2 = scmp.eq.s32.totalorder %s3011_s25, 1 }
   0x8   : > { %p174_p3 = scmp.ne.s32.totalorder %s2931_s22, %s2927_s21  ;;  %p175_p4 = scmp.eq.s32.totalorder %s2265_s26, 1 }
   0x9   : > { %s3026_s30 = scalar_select %p156_p1, %s2935_s23, %s158_s28  }
   0xa   : > { %p3028_p5 = por %p169_p2, %p168_p0  ;;  %p3032_p6 = por %p175_p4, %p174_p3 }
   0xb   : > { %p2266_p7 = scmp.ge.s32.totalorder %s2939_s24, 1  ;;  %p182_p8 = scmp.lt.s32.totalorder %s2939_s24, 3 }
   0xc   : > { %s3826_s8 = scalar_select %p3032_p6, 1, 0 }
   0xd   : > { %p2703_p9 = scmp.eq.s32.totalorder %s3011_s25, 0  ;;  %p3039_p10 = pnand %p2266_p7, %p182_p8 }
   0xe   : > { %s2941_s10 = smov [#allocation3]  }
   0xf   : > { %s197_s11 = sshll.u32 %s2941_s10, 4  ;;  %p2695_p11 = pneg %p3039_p10  ;;  %s198_s11 = int_to_ptr.vmem [resolvable:$true] %s197_s11 }
  0x10   : > { %s2860_s12 = scalar_lea.vmem %s198_s11, 9216  ;;  %p2868_p3 = scmp.lt.s32.totalorder %s198_s11, %s198_s11 }
  0x11   : > { %p2696_p12 = pnand %p2703_p9, %p2695_p11  ;;  %p2861_p0 = scmp.ne.s32.totalorder %s198_s11, %s2860_s12 }
  0x12   : > { %p2869_p4 = scmp.lt.s32.totalorder %s2860_s12, %s2860_s12 }
  0x13   : > { %p2851_p13 = pneg %p2696_p12 }
  0x14   : > { %p2870_p6 = por %p2869_p4, %p2868_p3 }
  0x15   : > { %p2863_p1 = pnand %p2861_p0, %p2851_p13 }
  0x17   : > { %p2864_p2 = pneg %p2863_p1 }
  0x19   : > { %p2871_p7 = pnand %p2870_p6, %p2864_p2 }
  0x1b   : > { %2874 = shalt.err (!%p2871_p7)
}
  0x1c   : > { %s2942_s13 = smov 64   ;;  %s2943_s14 = smov 4  }
  0x1d   : > { %2698 = dma.hbm_to_vmem [thread:$0]  (!%p2696_p12), %s3819_s2, 9216, %s198_s11, [#allocation4], %s2942_s13, %s2942_s13, %s2943_s14  }
  0x1e   : > { %232 = sbr.rel (%p3039_p10) target bundleno = 730 (0x2da), region = 44 }
  0x23   : > { %2918 = dma.done.wait (%p2703_p9), [#allocation4], 9216  }
  0x24   : > { %2920 = vsyncadd (%p2703_p9), [#allocation4], 4294958080  ;;  %s2272_s17 = sshll.u32 %s3011_s25, 2  ;;  %vm439_vm0 = vcmask 1045504   ;;  %vm373_vm1 = vcmask 1046528   ;;  %s2944_s28 = smov 16  }
  0x25   : > { %p264_p8 = scmp.lt.s32.totalorder %s2272_s17, 7  ;;  %vm316_vm2 = vsmask.f32 7424  ;;  %vm394_vm3 = vsmask.f32 6400  ;;  %s2945_s29 = smov 8  }
  0x26   : > { %vm460_vm4 = vsmask.f32 5376  ;;  %s2946_s9 = smov 4   ;;  %vm3824_vm5 = vcmask 1044480   ;;  %vm518_vm6 = vsmask.f32 4352 }
  0x27   : > { %s3866_s17 = smov (!%p264_p8, %s2272_s17), 7  ;;  %s2947_s10 = smov 12   ;;  %vm675_vm7 = vcmask 1041408   ;;  %vm567_vm8 = vcmask 31744   ;;  %vm576_vm9 = vcmask 64512   ;;  %vm585_vm10 = vcmask 97280  }
  0x28   : > { %s2688_s18 = smul.u32 12, %s3866_s17  ;;  %s2948_s11 = smov 20   ;;  %vm594_vm11 = vcmask 130048   ;;  %vm603_vm12 = vcmask 162816   ;;  %vm612_vm13 = vcmask 195584   ;;  %vm621_vm14 = vcmask 228352  }
  0x29   : > { %s2949_s12 = smov 24   ;;  %s2950_s13 = smov 28   ;;  %vm630_vm15 = vcmask 261120  }
  0x2a   : > { %s3060_s26 = scalar_lea.vmem %s3817_s0, %s2688_s18  ;;  %s2951_s14 = smov 32  }
  0x2b   : > { %v3063_v0 = vld [vmem:[%s3060_s26] sm:$0xf]  ;;  %v3066_v1 = vld [vmem:[%s3060_s26 + $0x4] sm:$0xf]  ;;  %v3069_v2 = vld [vmem:[%s3060_s26 + $0x8] sm:$0xf] }
  0x2c   : > { %v3073_v3 = vcombine.low %v3063_v0, %v3066_v1  ;;  %v3077_v4 = vcombine.low %v3069_v2, %v3069_v2  ;;  %v3080_v5 = vld [vmem:[%s3060_s26 + $0xc] sm:$0xf]  ;;  %v3083_v6 = vld [vmem:[%s3060_s26 + $0x10] sm:$0xf]  ;;  %v3086_v7 = vld [vmem:[%s3060_s26 + $0x14] sm:$0xf] }
  0x2d   : > { %v3090_v8 = vcombine.low %v3080_v5, %v3083_v6  ;;  %v3094_v9 = vcombine.low %v3086_v7, %v3086_v7  ;;  %s2430_s17 = sshll.u32 %s3011_s25, 9 }
  0x2e   : > { %v440_v10 = vrot.slane %v3073_v3, 2  ;;  %v441_v11 = vrot.slane %v3077_v4, 2  ;;  %v374_v12 = vrot.slane %v3073_v3, 1  ;;  %v375_v13 = vrot.slane %v3077_v4, 1  ;;  %s3772_s20 = scalar_lea.hbm %s3823_s6, %s2430_s17 }
  0x2f   : > { %v377_v14 = vrot.slane %v3090_v8, 1  ;;  %v378_v15 = vrot.slane %v3094_v9, 1  ;;  %v3103_v16 = vshrl.u32 %v3073_v3, 16  ;;  %v3106_v17 = vshll.u32 %v3073_v3, 16 }
  0x30   : > { %v442_v18 = vsel %vm439_vm0, %v440_v10, %v441_v11  ;;  %v376_v19 = vsel %vm373_vm1, %v374_v12, %v375_v13  ;;  %v3111_v20 = vshll.u32 %v3077_v4, 16  ;;  %v443_v21 = vrot.slane %v3090_v8, 2  ;;  %v3167_v11 = vld [vmem:[%s3060_s26 + $0x24] sm:$0xf]  ;;  %v3170_v12 = vld [vmem:[%s3060_s26 + $0x28] sm:$0xf] }
  0x31   : > { %452 = vrot.lane.b32.xlu0 %v442_v18, %s2944_s28  ;;  %386 = vrot.lane.b32.xlu1 %v376_v19, %s2945_s29  ;;  %v379_v22 = vsel %vm373_vm1, %v377_v14, %v378_v15  ;;  %v322_v23 = vrot.slane %v3106_v17, 1  ;;  %v444_v24 = vrot.slane %v3094_v9, 2  ;;  %v3120_v25 = vshrl.u32 %v3090_v8, 16  ;;  %v3173_v13 = vld [vmem:[%s3060_s26 + $0x18] sm:$0xf] }
  0x32   : > { %v327_v26 = vrot.slane %v3111_v20, 1  ;;  %v3124_v27 = vshll.u32 %v3090_v8, 16  ;;  %v3127_v28 = vshll.u32 %v3094_v9, 16  ;;  %v3130_v29 = vshrl.u32 %v3094_v9, 16  ;;  %v3176_v14 = vld [vmem:[%s3060_s26 + $0x1c] sm:$0xf] }
  0x33   : > { %v323_v30 = vor.u32 %v322_v23, %v3103_v16  ;;  %v445_v31 = vsel %vm439_vm0, %v443_v21, %v444_v24  ;;  %v404_v32 = vrot.slane %v3120_v25, 1  ;;  %v395_v33 = vrot.slane %v3103_v16, 1  ;;  %v3181_v21 = vld [vmem:[%s3060_s26 + $0x2c] sm:$0xf] }
  0x34   : > { %v334_v34 = vrot.slane %v3124_v27, 1  ;;  %v339_v35 = vrot.slane %v3127_v28, 1  ;;  %v405_v36 = vrot.slane %v3124_v27, 2  ;;  %v409_v37 = vrot.slane %v3130_v29, 1 }
  0x35   : > { %388 = vrot.lane.b32.xlu1 %v379_v22, %s2945_s29  ;;  %v328_v38 = vsel %vm316_vm2, %v323_v30, %v327_v26  ;;  %v410_v39 = vrot.slane %v3127_v28, 2  ;;  %v396_v40 = vrot.slane %v3106_v17, 2  ;;  %v3145_v41 = vshrl.u32 %v3077_v4, 16 }
  0x36   : > { %365 = vrot.lane.b32.xlu0 %v328_v38, %s2946_s9  ;;  %v335_v42 = vor.u32 %v334_v34, %v3120_v25  ;;  %v406_v43 = vor.u32 %v405_v36, %v404_v32  ;;  %v401_v44 = vrot.slane %v3111_v20, 2  ;;  %v468_v45 = vrot.slane %v3120_v25, 2 }
  0x37   : > { %v411_v46 = vor.u32 %v410_v39, %v409_v37  ;;  %v397_v47 = vor.u32 %v396_v40, %v395_v33  ;;  %v400_v48 = vrot.slane %v3145_v41, 1  ;;  %v469_v49 = vrot.slane %v3124_v27, 3 }
  0x38   : > { %v340_v50 = vsel %vm316_vm2, %v335_v42, %v339_v35  ;;  %v471_v51 = vrot.slane %v3130_v29, 2  ;;  %v472_v52 = vrot.slane %v3127_v28, 3  ;;  %v461_v53 = vrot.slane %v3103_v16, 2 }
  0x39   : > { %454 = vrot.lane.b32.xlu1 %v445_v31, %s2944_s28  ;;  %v412_v54 = vsel %vm394_vm3, %v406_v43, %v411_v46  ;;  %v402_v55 = vor.u32 %v401_v44, %v400_v48  ;;  %v462_v56 = vrot.slane %v3106_v17, 3  ;;  %v470_v57 = vor.u32 %v469_v49, %v468_v45  ;;  %v3193_v31 = vld [vmem:[%s3060_s26 + $0x20] sm:$0xf] }
  0x3a   : > { %367 = vrot.lane.b32.xlu0 %v340_v50, %s2946_s9  ;;  %v473_v58 = vor.u32 %v472_v52, %v471_v51  ;;  %v464_v59 = vrot.slane %v3145_v41, 2  ;;  %v465_v60 = vrot.slane %v3111_v20, 3  ;;  %v501_v63 = vrot.slane %v3090_v8, 3 }
  0x3b   : > { %v403_v61 = vsel %vm394_vm3, %v397_v47, %v402_v55  ;;  %v463_v62 = vor.u32 %v462_v56, %v461_v53  ;;  %v502_v10 = vrot.slane %v3094_v9, 3  ;;  %v498_v18 = vrot.slane %v3073_v3, 3 }
  0x3c   : > { %v466_v15 = vor.u32 %v465_v60, %v464_v59  ;;  %v499_v19 = vrot.slane %v3077_v4, 3  ;;  %v526_v9 = vrot.slane %v3120_v25, 3  ;;  %v527_v22 = vrot.slane %v3124_v27, 4 }
  0x3d   : > { %433 = vrot.lane.b32.xlu1 %v412_v54, %s2947_s10  ;;  %v529_v23 = vrot.slane %v3130_v29, 3  ;;  %v530_v24 = vrot.slane %v3127_v28, 4  ;;  %v474_v26 = vsel %vm460_vm4, %v470_v57, %v473_v58  ;;  %v519_v30 = vrot.slane %v3103_v16, 3 }
  0x3e   : > { %431 = vrot.lane.b32.xlu0 %v403_v61, %s2947_s10  ;;  %v520_v4 = vrot.slane %v3106_v17, 4  ;;  %v467_v32 = vsel %vm460_vm4, %v463_v62, %v466_v15  ;;  %v522_v25 = vrot.slane %v3145_v41, 3  ;;  %v523_v27 = vrot.slane %v3111_v20, 4 }
  0x3f   : > { %v3200_v29 = vcombine.low %v3167_v11, %v3170_v12  ;;  %v3204_v28 = vcombine.low %v3173_v13, %v3176_v14  ;;  %v503_v16 = vsel %vm3824_vm5, %v501_v63, %v502_v10  ;;  %v3210_v17 = vcombine.low %v3181_v21, %v3181_v21 }
  0x40   : > { %v500_v20 = vsel %vm3824_vm5, %v498_v18, %v499_v19  ;;  %v528_v33 = vor.u32 %v527_v22, %v526_v9  ;;  %v531_v34 = vor.u32 %v530_v24, %v529_v23  ;;  %v521_v36 = vor.u32 %v520_v4, %v519_v30 }
  0x41   : > { %491 = vrot.lane.b32.xlu1 %v474_v26, %s2948_s11  ;;  %v3215_v35 = vshll.u32 %v3200_v29, 16  ;;  %v524_v37 = vor.u32 %v523_v27, %v522_v25  ;;  %v3219_v38 = vcombine.low %v3193_v31, %v3193_v31  ;;  %v3222_v39 = vshll.u32 %v3204_v28, 16 }
  0x42   : > { %489 = vrot.lane.b32.xlu0 %v467_v32, %s2948_s11  ;;  %v3226_v40 = vshrl.u32 %v3200_v29, 16  ;;  %v3229_v41 = vshll.u32 %v3210_v17, 16  ;;  %v532_v42 = vsel %vm518_vm6, %v528_v33, %v531_v34  ;;  %v3235_v44 = vshrl.u32 %v3204_v28, 16 }
  0x43   : > { %v358_v43 = vrot.slane %v3215_v35, 1  ;;  %v525_v45 = vsel %vm518_vm6, %v521_v36, %v524_v37  ;;  %v346_v46 = vrot.slane %v3222_v39, 1  ;;  %v3240_v47 = vshll.u32 %v3219_v38, 16 }
  0x44   : > { %v2283_v48 = vcombine.low %v3083_v6, %v3086_v7  ;;  %v3245_v49 = vshrl.u32 %v3210_v17, 16  ;;  %v363_v50 = vrot.slane %v3229_v41, 1  ;;  %v383_v51 = vrot.slane %v3200_v29, 1 }
  0x45   : > { %512 = vrot.lane.b32.xlu1 %v503_v16, %s2949_s12  ;;  %v384_v52 = vrot.slane %v3210_v17, 1  ;;  %v3252_v53 = vshrl.u32 %v3219_v38, 16  ;;  %v2282_v54 = vcombine.low %v3066_v1, %v3069_v2  ;;  %v359_v55 = vor.u32 %v358_v43, %v3226_v40  ;;  %v2763_v16 = vld [vmem:[%s3818_s1 + $0x10] ss:$0 sps:$4 sm:$0x33]  }
  0x46   : > { %510 = vrot.lane.b32.xlu0 %v500_v20, %s2949_s12  ;;  %v422_v56 = vrot.slane %v3226_v40, 1  ;;  %v423_v57 = vrot.slane %v3215_v35, 2  ;;  %v347_v58 = vor.u32 %v346_v46, %v3235_v44  ;;  %v351_v59 = vrot.slane %v3240_v47, 1  ;;  %v2764_v46 = vld [vmem:[%s3818_s1 + $0x8] sm:$0xff]   ;;  %2686 = vmatprep.subr.msk.bf16.mxu0 %vm675_vm7, %v2763_v16 }
  0x47   : > { %v428_v60 = vrot.slane %v3229_v41, 2  ;;  %v413_v61 = vrot.slane %v3235_v44, 1  ;;  %v427_v62 = vrot.slane %v3245_v49, 1  ;;  %v414_v63 = vrot.slane %v3222_v39, 2 }
  0x48   : > { %v418_v10 = vrot.slane %v3252_v53, 1  ;;  %v419_v15 = vrot.slane %v3240_v47, 2  ;;  %v364_v18 = vsel %vm316_vm2, %v359_v55, %v363_v50  ;;  %v380_v19 = vrot.slane %v3204_v28, 1 }
  0x49   : > { %549 = vrot.lane.b32.xlu1 %v532_v42, %s2950_s13  ;;  %v381_v9 = vrot.slane %v3219_v38, 1  ;;  %v424_v22 = vor.u32 %v423_v57, %v422_v56  ;;  %v352_v23 = vsel %vm316_vm2, %v347_v58, %v351_v59  ;;  %v449_v24 = vrot.slane %v3200_v29, 2 }
  0x4a   : > { %547 = vrot.lane.b32.xlu0 %v525_v45, %s2950_s13  ;;  %v450_v26 = vrot.slane %v3210_v17, 2  ;;  %v446_v30 = vrot.slane %v3204_v28, 2  ;;  %v429_v4 = vor.u32 %v428_v60, %v427_v62  ;;  %v415_v32 = vor.u32 %v414_v63, %v413_v61  ;;  %v2765_v61 = vld [vmem:[%s3818_s1] sm:$0xff]  }
  0x4b   : > { %v447_v25 = vrot.slane %v3219_v38, 2  ;;  %v482_v27 = vrot.slane %v3226_v40, 2  ;;  %v420_v20 = vor.u32 %v419_v15, %v418_v10  ;;  %v483_v33 = vrot.slane %v3215_v35, 3 }
  0x4c   : > { %v485_v34 = vrot.slane %v3245_v49, 2  ;;  %v486_v36 = vrot.slane %v3229_v41, 3  ;;  %v385_v37 = vsel %vm373_vm1, %v383_v51, %v384_v52  ;;  %v382_v42 = vsel %vm373_vm1, %v380_v19, %v381_v9 }
  0x4d   : > { %561 = vrot.lane.b32.xlu1 %v2283_v48, %s2951_s14  ;;  %v475_v43 = vrot.slane %v3235_v44, 2  ;;  %v476_v45 = vrot.slane %v3222_v39, 3  ;;  %v478_v48 = vrot.slane %v3252_v53, 2  ;;  %v479_v50 = vrot.slane %v3240_v47, 3 }
  0x4e   : > { %559 = vrot.lane.b32.xlu0 %v2282_v54, %s2951_s14  ;;  %v507_v54 = vrot.slane %v3200_v29, 3  ;;  %v508_v55 = vrot.slane %v3210_v17, 3  ;;  %v504_v51 = vrot.slane %v3204_v28, 3  ;;  %v505_v52 = vrot.slane %v3219_v38, 3 }
  0x4f   : > { %v430_v56 = vsel %vm394_vm3, %v424_v22, %v429_v4  ;;  %v421_v57 = vsel %vm394_vm3, %v415_v32, %v420_v20  ;;  %v540_v58 = vrot.slane %v3226_v40, 3  ;;  %v541_v59 = vrot.slane %v3215_v35, 4 }
  0x50   : > { %v543_v60 = vrot.slane %v3245_v49, 3  ;;  %v544_v17 = vrot.slane %v3229_v41, 4  ;;  %v677_v38 = vsel %vm675_vm7, %v2763_v16, 0  ;;  %v533_v62 = vrot.slane %v3235_v44, 3 }
  0x51   : > { %371 = vrot.lane.b32.xlu1 %v364_v18, %s2946_s9  ;;  %v534_v40 = vrot.slane %v3222_v39, 4  ;;  %v536_v63 = vrot.slane %v3252_v53, 3  ;;  %v537_v35 = vrot.slane %v3240_v47, 4  ;;  %2639 = vmatpush3.bf16.msra.mxu0 %v677_v38  ;;  %v451_v41 = vsel %vm439_vm0, %v449_v24, %v450_v26  ;;  %v859_v26 = vld [vmem:[%s3820_s3] sm:$0x3] }
  0x52   : > { %369 = vrot.lane.b32.xlu0 %v352_v23, %s2946_s9  ;;  %2640 = vmatprep.subr.bf16.mxu0 %v2764_v46  ;;  %v484_v49 = vor.u32 %v483_v33, %v482_v27  ;;  %v487_v10 = vor.u32 %v486_v36, %v485_v34  ;;  %v448_v15 = vsel %vm439_vm0, %v446_v30, %v447_v25  ;;  %v892_v30 = vsel %vm675_vm7, %v859_v26, 0 }
  0x53   : > { %v477_v18 = vor.u32 %v476_v45, %v475_v43  ;;  %v480_v44 = vor.u32 %v479_v50, %v478_v48  ;;  %v509_v53 = vsel %vm3824_vm5, %v507_v54, %v508_v55  ;;  %v542_v19 = vor.u32 %v541_v59, %v540_v58  ;;  %2687 = vmatprep.subr.msk.bf16.mxu1 %vm675_vm7, %v859_v26 }
  0x54   : > { %v488_v39 = vsel %vm460_vm4, %v484_v49, %v487_v10  ;;  %v545_v9 = vor.u32 %v544_v17, %v543_v60  ;;  %v506_v22 = vsel %vm3824_vm5, %v504_v51, %v505_v52  ;;  %v535_v23 = vor.u32 %v534_v40, %v533_v62  ;;  %2653 = vmatpush3.bf16.msra.mxu1 %v892_v30 }
  0x55   : > { %392 = vrot.lane.b32.xlu1 %v385_v37, %s2945_s29  ;;  %2641 = vmatpush3.bf16.msra.mxu0 %v2764_v46  ;;  %v481_v47 = vsel %vm460_vm4, %v477_v18, %v480_v44  ;;  %v538_v24 = vor.u32 %v537_v35, %v536_v63  ;;  %v2285_v25 = vcombine.low %v3170_v12, %v3181_v21  ;;  %vm666_vm5 = vcmask 293888  }
  0x56   : > { %390 = vrot.lane.b32.xlu0 %v382_v42, %s2945_s29  ;;  %2642 = vmatprep.subr.bf16.mxu0 %v2765_v61  ;;  %v546_v4 = vsel %vm518_vm6, %v542_v19, %v545_v9  ;;  %v2284_v27 = vcombine.low %v3176_v14, %v3193_v31  ;;  %s2953_s29 = smov [#allocation6]  }
  0x57   : > { %v539_v32 = vsel %vm518_vm6, %v535_v23, %v538_v24 }
  0x59   : > { %437 = vrot.lane.b32.xlu1 %v430_v56, %s2947_s10  ;;  %2643 = vmatpush3.bf16.msra.mxu0 %v2765_v61 }
  0x5a   : > { %435 = vrot.lane.b32.xlu0 %v421_v57, %s2947_s10 }
  0x5d   : > { %458 = vrot.lane.b32.xlu1 %v451_v41, %s2944_s28 }
  0x5e   : > { %456 = vrot.lane.b32.xlu0 %v448_v15, %s2944_s28  ;;  %s2879_s28 = sshll.u32 %s2953_s29, 4  ;;  %s2880_s28 = int_to_ptr.vmem [resolvable:$false] %s2879_s28 }
  0x5f   : > { %s2881_s10 = scalar_lea.vmem %s2880_s28, 1024 }
  0x61   : > { %495 = vrot.lane.b32.xlu1 %v488_v39, %s2948_s11 }
  0x62   : > { %493 = vrot.lane.b32.xlu0 %v481_v47, %s2948_s11 }
  0x65   : > { %516 = vrot.lane.b32.xlu1 %v509_v53, %s2949_s12 }
  0x66   : > { %514 = vrot.lane.b32.xlu0 %v506_v22, %s2949_s12 }
  0x69   : > { %553 = vrot.lane.b32.xlu1 %v546_v4, %s2950_s13 }
  0x6a   : > { %551 = vrot.lane.b32.xlu0 %v539_v32, %s2950_s13  ;;  %s260_s13 = sand.u32 1, %s2931_s22  }
  0x6b   : > { %s3776_s26 = scalar_lea.sflag [#allocation5], %s260_s13 }
  0x6d   : > { %565 = vrot.lane.b32.xlu1 %v2285_v25, %s2951_s14 }
  0x6e   : > { %563 = vrot.lane.b32.xlu0 %v2284_v27, %s2951_s14  ;;  %s2271_s14 = sshll.u32 %s260_s13, 5 }
  0x6f   : > { %s262_s15 = scalar_lea.vmem [#allocation6], %s2271_s14 }
  0x70   : > { %s2191_s16 = sshll.u32 %s262_s15, 4  ;;  %s3767_s16 = int_to_ptr.vmem [resolvable:$true] %s2191_s16 }
  0x71   : > { %s2875_s25 = scalar_lea.vmem %s3767_s16, 512  ;;  %p2882_p11 = scmp.lt.s32.totalorder %s3767_s16, %s2880_s28 }
  0x72   : > { %p2876_p6 = scmp.ne.s32.totalorder %s3767_s16, %s2875_s25  ;;  %p2883_p12 = scmp.lt.s32.totalorder %s2881_s10, %s2875_s25 }
  0x74   : > { %p2877_p9 = pnand %p2876_p6, %p3028_p5  ;;  %p2884_p13 = por %p2883_p12, %p2882_p11 }
  0x76   : > { %p2878_p10 = pneg %p2877_p9 }
  0x78   : > { %p2885_p0 = pnand %p2884_p13, %p2878_p10 }
  0xa3   : > { %v453_v16 = vpop.permute.xlu0 %452  ;;  %v387_v20 = vpop.permute.xlu1 %386 }
  0xa7   : > { %v389_v33 = vpop.permute.xlu1 %388 }
  0xa8   : > { %v366_v34 = vpop.permute.xlu0 %365 }
  0xa9   : > { %v569_v50 = vsel %vm567_vm8, %v3073_v3, %v366_v34 }
  0xaa   : > { %v578_v56 = vsel %vm576_vm9, %v569_v50, %v387_v20 }
  0xab   : > { %v455_v36 = vpop.permute.xlu1 %454 }
  0xac   : > { %v368_v37 = vpop.permute.xlu0 %367 }
  0xad   : > { %v571_v48 = vsel %vm567_vm8, %v3090_v8, %v368_v37 }
  0xae   : > { %v580_v55 = vsel %vm576_vm9, %v571_v48, %v389_v33 }
  0xaf   : > { %v434_v42 = vpop.permute.xlu1 %433 }
  0xb0   : > { %v432_v43 = vpop.permute.xlu0 %431  ;;  %v589_v52 = vsel %vm585_vm10, %v580_v55, %v434_v42 }
  0xb1   : > { %v587_v57 = vsel %vm585_vm10, %v578_v56, %v432_v43  ;;  %v598_v8 = vsel %vm594_vm11, %v589_v52, %v455_v36  ;;  %v2302_v52 = vrot.slane %v3063_v0, 10 }
  0xb2   : > { %v596_v60 = vsel %vm594_vm11, %v587_v57, %v453_v16  ;;  %v836_v57 = vrot.slane %v3069_v2, 6 }
  0xb3   : > { %v492_v45 = vpop.permute.xlu1 %491 }
  0xb4   : > { %v490_v46 = vpop.permute.xlu0 %489  ;;  %v607_v59 = vsel %vm603_vm12, %v598_v8, %v492_v45 }
  0xb5   : > { %v605_v17 = vsel %vm603_vm12, %v596_v60, %v490_v46 }
  0xb7   : > { %v513_v54 = vpop.permute.xlu1 %512 }
  0xb8   : > { %v511_v51 = vpop.permute.xlu0 %510  ;;  %v616_v38 = vsel %vm612_vm13, %v607_v59, %v513_v54  ;;  %v833_v54 = vrot.slane %v3066_v1, 6 }
  0xb9   : > { %v614_v61 = vsel %vm612_vm13, %v605_v17, %v511_v51  ;;  %v840_v51 = vrot.slane %v3083_v6, 6  ;;  %v2766_v17 = vld [vmem:[#allocation3 + $0x78] sm:$0xff]  }
  0xba   : > { %v835_v56 = vrot.slane %v833_v54, 4  ;;  %2466 = vmatprep.subr.bf16.mxu1 %v2766_v17 }
  0xbb   : > { %v550_v58 = vpop.permute.xlu1 %549  ;;  %v842_v8 = vrot.slane %v840_v51, 4 }
  0xbc   : > { %v548_v3 = vpop.permute.xlu0 %547  ;;  %v625_v62 = vsel %vm621_vm14, %v616_v38, %v550_v58  ;;  %v2303_v58 = vrot.slane %v3080_v5, 10  ;;  %v2767_v38 = vld [vmem:[#allocation3 + $0x38] sm:$0xff]  }
  0xbd   : > { %v623_v63 = vsel %vm621_vm14, %v614_v61, %v548_v3  ;;  %v843_v3 = vrot.slane %v3086_v7, 6  ;;  %v2768_v5 = vld [vmem:[#allocation3 + $0xf8] sm:$0xff]   ;;  %v2770_v61 = vld [vmem:[#allocation3 + $0x70] sm:$0xff]  }
  0xbe   : > { %v2769_v7 = vld [vmem:[#allocation3 + $0xb8] sm:$0xff]   ;;  %2506 = vmatprep.subr.bf16.mxu0 %v2768_v5 }
  0xbf   : > { %v562_v40 = vpop.permute.xlu1 %561 }
  0xc0   : > { %v634_v35 = vsel %vm630_vm15, %v625_v62, %v562_v40  ;;  %v560_v41 = vpop.permute.xlu0 %559  ;;  %v2771_v62 = vld [vmem:[#allocation3 + $0x30] sm:$0xff]  }
  0xc1   : > { %v632_v49 = vsel %vm630_vm15, %v623_v63, %v560_v41  ;;  %v2772_v40 = vld [vmem:[#allocation3 + $0xf0] sm:$0xff]   ;;  %v2775_v41 = vld [vmem:[#allocation3 + $0x28] sm:$0xff]  }
  0xc2   : > { %2644 = vmatprep.mubr.msk.bf16.mxu0 %vm666_vm5, %v632_v49  ;;  %v2773_v63 = vld [vmem:[#allocation3 + $0xb0] sm:$0xff]   ;;  %v2776_v49 = vld [vmem:[#allocation3 + $0xe8] sm:$0xff]  }
  0xc3   : > { %2645 = vmatmul.mubr.msk.bf16.vlgmr.msra.gmra.mxu0 %vm666_vm5, %v634_v35  ;;  %v372_v10 = vpop.permute.xlu1 %371  ;;  %v2774_v35 = vld [vmem:[#allocation3 + $0x68] sm:$0xff]  }
  0xc4   : > { %v370_v15 = vpop.permute.xlu0 %369  ;;  %v575_v26 = vsel %vm567_vm8, %v3200_v29, %v372_v10  ;;  %2507 = vmatpush3.bf16.msra.mxu0 %v2769_v7  ;;  %v2952_v10 = vmov 0  }
  0xc5   : > { %v573_v30 = vsel %vm567_vm8, %v3204_v28, %v370_v15  ;;  %2508 = vmatprep.subr.bf16.mxu0 %v2772_v40  ;;  %756 = vst [vmem:[#allocation2] sm:$0x3] %v2952_v10  ;;  %760 = vst [vmem:[#allocation2 + $0x8] sm:$0xc] %v2952_v10  ;;  %v2777_v15 = vld [vmem:[#allocation3 + $0xa8] sm:$0xff]  }
  0xc6   : > { %757 = vst [vmem:[#allocation2 + $0xc] sm:$0x3] %v2952_v10  ;;  %758 = vst [vmem:[#allocation2 + $0x18] sm:$0x3] %v2952_v10 }
  0xc7   : > { %v393_v18 = vpop.permute.xlu1 %392  ;;  %759 = vst [vmem:[#allocation2 + $0x24] sm:$0x3] %v2952_v10  ;;  %761 = vst [vmem:[#allocation2 + $0x14] sm:$0xc] %v2952_v10 }
  0xc8   : > { %v391_v44 = vpop.permute.xlu0 %390  ;;  %v584_v4 = vsel %vm576_vm9, %v575_v26, %v393_v18  ;;  %2509 = vmatpush3.bf16.msra.mxu0 %v2773_v63  ;;  %762 = vst [vmem:[#allocation2 + $0x20] sm:$0xc] %v2952_v10  ;;  %763 = vst [vmem:[#allocation2 + $0x2c] sm:$0xc] %v2952_v10  ;;  %v2778_v18 = vld [vmem:[#allocation3 + $0x60] sm:$0xff]   ;;  %v850_v26 = vrot.slane %v3193_v31, 6 }
  0xc9   : > { %v582_v32 = vsel %vm576_vm9, %v573_v30, %v391_v44  ;;  %vm785_vm9 = vcmask 1045508   ;;  %2510 = vmatprep.subr.bf16.mxu0 %v2776_v49  ;;  %v2779_v44 = vld [vmem:[#allocation3 + $0x20] sm:$0xff]   ;;  %v2786_v30 = vld [vmem:[#allocation3 + $0x50] sm:$0xff]  }
  0xcb   : > { %v438_v39 = vpop.permute.xlu1 %437 }
  0xcc   : > { %v436_v47 = vpop.permute.xlu0 %435  ;;  %v593_v25 = vsel %vm585_vm10, %v584_v4, %v438_v39  ;;  %2511 = vmatpush3.bf16.msra.mxu0 %v2777_v15  ;;  %v2780_v39 = vld [vmem:[#allocation3 + $0xe0] sm:$0xff]   ;;  %v2788_v4 = vld [vmem:[#allocation3 + $0xd0] sm:$0xff]  }
  0xcd   : > { %v591_v16 = vsel %vm585_vm10, %v582_v32, %v436_v47  ;;  %vm3388_vm10 = vmor %vm675_vm7, %vm785_vm9  ;;  %v2781_v47 = vld [vmem:[#allocation3 + $0xa0] sm:$0xff]   ;;  %2512 = vmatprep.subr.bf16.mxu0 %v2780_v39  ;;  %v2305_v32 = vrot.slane %v3167_v11, 10 }
  0xce   : > { %v834_v1 = vsel %vm3388_vm10, %v2302_v52, %v833_v54  ;;  %v837_v59 = vsel %vm3388_vm10, %v835_v56, %v836_v57  ;;  %v841_v6 = vsel %vm3388_vm10, %v2303_v58, %v840_v51  ;;  %v844_v0 = vsel %vm3388_vm10, %v842_v8, %v843_v3  ;;  %v3426_v54 = vld [vmem:[%s3821_s4] ss:$0 sm:$0xff] }
  0xcf   : > { %v459_v53 = vpop.permute.xlu1 %458  ;;  %v2307_v60 = vcombine.low %v834_v1, %v837_v59  ;;  %v2308_v2 = vcombine.low %v841_v6, %v844_v0 }
  0xd0   : > { %v457_v19 = vpop.permute.xlu0 %456  ;;  %v602_v20 = vsel %vm594_vm11, %v593_v25, %v459_v53  ;;  %2513 = vmatpush3.bf16.msra.mxu0 %v2781_v47  ;;  %v2782_v53 = vld [vmem:[#allocation3 + $0x58] sm:$0xff]   ;;  %v854_v25 = vrot.slane %v3170_v12, 6  ;;  %v2790_v12 = vld [vmem:[#allocation3 + $0x48] sm:$0xff]  }
  0xd1   : > { %v600_v34 = vsel %vm594_vm11, %v591_v16, %v457_v19  ;;  %2654 = vmatprep.mubr.msk.bf16.mxu1 %vm567_vm8, %v2307_v60  ;;  %v2783_v19 = vld [vmem:[#allocation3 + $0x18] sm:$0xff]  }
  0xd2   : > { %2655 = vmatmul.mubr.msk.bf16.vlgmr.msra.gmra.mxu1 %vm567_vm8, %v2308_v2  ;;  %v855_v31 = vsel %vm3388_vm10, %v2305_v32, %v854_v25 }
  0xd3   : > { %v496_v9 = vpop.permute.xlu1 %495  ;;  %2467 = vmatpush3.bf16.msra.mxu1 %v2767_v38 }
  0xd4   : > { %v494_v22 = vpop.permute.xlu0 %493  ;;  %v611_v36 = vsel %vm603_vm12, %v602_v20, %v496_v9  ;;  %2468 = vmatprep.subr.bf16.mxu1 %v2770_v61  ;;  %v2784_v9 = vld [vmem:[#allocation3 + $0xd8] sm:$0xff]  }
  0xd5   : > { %v609_v29 = vsel %vm603_vm12, %v600_v34, %v494_v22  ;;  %v2785_v22 = vld [vmem:[#allocation3 + $0x98] sm:$0xff]   ;;  %2514 = vmatprep.subr.bf16.mxu0 %v2784_v9 }
  0xd6   : > { %2515 = vmatpush3.bf16.msra.mxu0 %v2785_v22 }
  0xd7   : > { %v517_v23 = vpop.permute.xlu1 %516  ;;  %2469 = vmatpush3.bf16.msra.mxu1 %v2771_v62  ;;  %2516 = vmatprep.subr.bf16.mxu0 %v2788_v4 }
  0xd8   : > { %v515_v24 = vpop.permute.xlu0 %514  ;;  %v620_v28 = vsel %vm612_vm13, %v611_v36, %v517_v23  ;;  %2470 = vmatprep.subr.bf16.mxu1 %v2774_v35  ;;  %v2304_v23 = vrot.slane %v3173_v13, 10  ;;  %v2787_v13 = vld [vmem:[#allocation3 + $0x10] sm:$0xff]   ;;  %v2792_v36 = vld [vmem:[#allocation3 + $0xc8] sm:$0xff]  }
  0xd9   : > { %v618_v37 = vsel %vm612_vm13, %v609_v29, %v515_v24  ;;  %v847_v24 = vrot.slane %v3176_v14, 6  ;;  %v2789_v14 = vld [vmem:[#allocation3 + $0x90] sm:$0xff]  }
  0xda   : > { %2517 = vmatpush3.bf16.msra.mxu0 %v2789_v14 }
  0xdb   : > { %v554_v27 = vpop.permute.xlu1 %553  ;;  %2471 = vmatpush3.bf16.msra.mxu1 %v2775_v41  ;;  %v848_v16 = vsel %vm3388_vm10, %v2304_v23, %v847_v24  ;;  %v849_v20 = vrot.slane %v847_v24, 4  ;;  %2518 = vmatprep.subr.bf16.mxu0 %v2792_v36 }
  0xdc   : > { %v552_v33 = vpop.permute.xlu0 %551  ;;  %v629_v42 = vsel %vm621_vm14, %v620_v28, %v554_v27  ;;  %2472 = vmatprep.subr.bf16.mxu1 %v2778_v18  ;;  %v857_v27 = vrot.slane %v3181_v21, 6  ;;  %v2791_v28 = vld [vmem:[#allocation3 + $0x8] sm:$0xff]  }
  0xdd   : > { %v627_v45 = vsel %vm621_vm14, %v618_v37, %v552_v33  ;;  %v856_v33 = vrot.slane %v854_v25, 4  ;;  %v851_v11 = vsel %vm3388_vm10, %v849_v20, %v850_v26  ;;  %v2793_v37 = vld [vmem:[#allocation3 + $0x88] sm:$0xff]  }
  0xde   : > { %v2309_v21 = vcombine.low %v848_v16, %v851_v11  ;;  %2519 = vmatpush3.bf16.msra.mxu0 %v2793_v37 }
  0xdf   : > { %v566_v43 = vpop.permute.xlu1 %565  ;;  %2473 = vmatpush3.bf16.msra.mxu1 %v2779_v44  ;;  %v858_v34 = vsel %vm3388_vm10, %v856_v33, %v857_v27 }
  0xe0   : > { %v638_v46 = vsel %vm630_vm15, %v629_v42, %v566_v43  ;;  %v564_v48 = vpop.permute.xlu0 %563  ;;  %2474 = vmatprep.subr.bf16.mxu1 %v2782_v53  ;;  %v2310_v29 = vcombine.low %v855_v31, %v858_v34  ;;  %2658 = vmatprep.mubr.msk.bf16.mxu1 %vm567_vm8, %v2309_v21  ;;  %v2794_v42 = vld [vmem:[#allocation3 + $0x40] sm:$0xff]  }
  0xe1   : > { %v636_v50 = vsel %vm630_vm15, %v627_v45, %v564_v48  ;;  %v2796_v43 = vld [vmem:[#allocation3 + $0xc0] sm:$0xff]   ;;  %v2802_v48 = vld [vmem:[#allocation3 + $0x178] sm:$0xff]  }
  0xe2   : > { %2648 = vmatprep.mubr.msk.bf16.mxu0 %vm666_vm5, %v636_v50  ;;  %2659 = vmatmul.mubr.msk.bf16.gmra.mxu1 %vm567_vm8, %v2310_v29  ;;  %v2795_v45 = vld [vmem:[#allocation3] sm:$0xff]   ;;  %v2804_v50 = vld [vmem:[#allocation3 + $0x1f8] sm:$0xff]  }
  0xe3   : > { %2649 = vmatmul.mubr.msk.bf16.gmra.mxu0 %vm666_vm5, %v638_v46  ;;  %2475 = vmatpush3.bf16.msra.mxu1 %v2783_v19  ;;  %v2797_v46 = vld [vmem:[#allocation3 + $0x80] sm:$0xff]  }
  0xe4   : > { %2476 = vmatprep.subr.bf16.mxu1 %v2786_v30  ;;  %2520 = vmatprep.subr.bf16.mxu0 %v2796_v43 }
  0xe5   : > { %2521 = vmatpush3.bf16.msra.mxu0 %v2797_v46 }
  0xe6   : > { %2586 = vmatprep.subr.bf16.mxu0 %v2804_v50 }
  0xe7   : > { %2477 = vmatpush3.bf16.msra.mxu1 %v2787_v13 }
  0xe8   : > { %2478 = vmatprep.subr.bf16.mxu1 %v2790_v12 }
  0xeb   : > { %2479 = vmatpush3.bf16.msra.mxu1 %v2791_v28 }
  0xec   : > { %2480 = vmatprep.subr.bf16.mxu1 %v2794_v42 }
  0xef   : > { %2481 = vmatpush3.bf16.msra.mxu1 %v2795_v45 }
  0xf0   : > { %2546 = vmatprep.subr.bf16.mxu1 %v2802_v48 }
 0x183   : > { %v2646_v51 = vpop.f32.mrf.mxu0 }
 0x184   : > { %v722_v52 = vadd.f32 %v2646_v51, %v3426_v54 }
 0x185   : > { %v713_v56 = vpop.f32.mrf.mxu0 }
 0x186   : > { %v746_v57 = vmax.f32 %v722_v52, 0.0  ;;  %v714_v58 = vadd.f32 %v3426_v54, %v713_v56 }
 0x187   : > { %v2647_v8 = vpop.f32.mrf.mxu0 }
 0x188   : > { %v2415_v3 = vpack.c.bf16 %v746_v57, %v746_v57  ;;  %v744_v1 = vmax.f32 %v714_v58, 0.0  ;;  %v725_v59 = vadd.f32 %v2647_v8, %v3426_v54  ;;  %v2803_v57 = vld [vmem:[#allocation3 + $0x138] sm:$0xff]  }
 0x189   : > { %v716_v60 = vpop.f32.mrf.mxu0 }
 0x18a   : > { %v792_v17 = vrot.slane %v2415_v3, 6  ;;  %v2413_v6 = vpack.c.bf16 %v744_v1, %v744_v1  ;;  %v747_v0 = vmax.f32 %v725_v59, 0.0  ;;  %v717_v2 = vadd.f32 %v3426_v54, %v716_v60  ;;  %v2805_v59 = vld [vmem:[#allocation3 + $0x1b8] sm:$0xff]   ;;  %v2806_v60 = vld [vmem:[#allocation3 + $0x170] sm:$0xff]  }
 0x18c   : > { %822 = vst [vmem:[#allocation2 + $0xc] sm:$0xc] %v792_v17  ;;  %v787_v38 = vrot.slane %v2413_v6, 6  ;;  %v2416_v5 = vpack.c.bf16 %v747_v0, %v747_v0  ;;  %v745_v7 = vmax.f32 %v717_v2, 0.0  ;;  %v793_v61 = vrot.slane %v792_v17, 4  ;;  %v2808_v2 = vld [vmem:[#allocation3 + $0x1f0] sm:$0xff]  }
 0x18e   : > { %819 = vst [vmem:[#allocation2] sm:$0xc] %v787_v38  ;;  %v794_v62 = vrot.slane %v2416_v5, 6  ;;  %v2414_v40 = vpack.c.bf16 %v745_v7, %v745_v7  ;;  %v788_v63 = vrot.slane %v787_v38, 4 }
 0x190   : > { %v795_v35 = vsel %vm3388_vm10, %v793_v61, %v794_v62  ;;  %v796_v41 = vrot.slane %v794_v62, 4  ;;  %v789_v49 = vrot.slane %v2414_v40, 6  ;;  %v2807_v62 = vld [vmem:[#allocation3 + $0x130] sm:$0xff]  }
 0x191   : > { %823 = vst [vmem:[#allocation2 + $0x10] sm:$0xf] %v795_v35 }
 0x192   : > { %824 = vst [vmem:[#allocation2 + $0x14] sm:$0x3] %v796_v41  ;;  %v790_v10 = vsel %vm3388_vm10, %v788_v63, %v789_v49  ;;  %v791_v15 = vrot.slane %v789_v49, 4  ;;  %v2809_v41 = vld [vmem:[#allocation3 + $0x1b0] sm:$0xff]   ;;  %v2810_v49 = vld [vmem:[#allocation3 + $0x168] sm:$0xff]  }
 0x193   : > { %820 = vst [vmem:[#allocation2 + $0x4] sm:$0xf] %v790_v10  ;;  %v962_v18 = vld [vmem:[#allocation2 + $0xc] sm:$0xf] }
 0x194   : > { %821 = vst [vmem:[#allocation2 + $0x8] sm:$0x3] %v791_v15 }
 0x195   : > { %v959_v53 = vld [vmem:[#allocation2] sm:$0xf] }
 0x198   : > { %v3436_v44 = vld [vmem:[#allocation2 + $0x10] sm:$0xf] }
 0x199   : > { %v3438_v39 = vld [vmem:[#allocation2 + $0x14] sm:$0xf]  ;;  %v3441_v47 = vcombine.low %v962_v18, %v3436_v44 }
 0x19a   : > { %v3443_v19 = vld [vmem:[#allocation2 + $0x4] sm:$0xf]  ;;  %v3447_v9 = vcombine.low %v3438_v39, %v3438_v39  ;;  %v2324_v22 = vcombine.low %v3436_v44, %v3438_v39 }
 0x19b   : > { %v3451_v23 = vld [vmem:[#allocation2 + $0x8] sm:$0xf]  ;;  %v3454_v24 = vcombine.low %v959_v53, %v3443_v19  ;;  %v3457_v26 = vshll.u32 %v3441_v47, 16  ;;  %v3473_v27 = vshrl.u32 %v3441_v47, 16  ;;  %v1062_v15 = vrot.slane %v3441_v47, 1  ;;  %v2812_v53 = vld [vmem:[#allocation3 + $0x1e8] sm:$0xff]  }
 0x19c   : > { %v3461_v30 = vcombine.low %v3451_v23, %v3451_v23  ;;  %v3464_v4 = vshll.u32 %v3447_v9, 16  ;;  %v3484_v31 = vshrl.u32 %v3447_v9, 16  ;;  %v1063_v18 = vrot.slane %v3447_v9, 1 }
 0x19d   : > { %v3467_v32 = vshrl.u32 %v3454_v24, 16  ;;  %v3470_v25 = vshll.u32 %v3454_v24, 16  ;;  %v1024_v16 = vrot.slane %v3457_v26, 1  ;;  %v1059_v14 = vrot.slane %v3454_v24, 1 }
 0x19e   : > { %v3477_v20 = vshll.u32 %v3461_v30, 16  ;;  %v3480_v13 = vshrl.u32 %v3461_v30, 16  ;;  %v1029_v21 = vrot.slane %v3464_v4, 1  ;;  %v1060_v28 = vrot.slane %v3461_v30, 1 }
 0x19f   : > { %v1012_v33 = vrot.slane %v3470_v25, 1  ;;  %v1075_v11 = vrot.slane %v3467_v32, 1  ;;  %v1076_v12 = vrot.slane %v3470_v25, 2  ;;  %v1025_v43 = vor.u32 %v1024_v16, %v3473_v27 }
 0x1a0   : > { %v1017_v34 = vrot.slane %v3477_v20, 1  ;;  %v1080_v36 = vrot.slane %v3480_v13, 1  ;;  %v1081_v29 = vrot.slane %v3477_v20, 2  ;;  %v1084_v45 = vrot.slane %v3473_v27, 1 }
 0x1a1   : > { %v1013_v37 = vor.u32 %v1012_v33, %v3467_v32  ;;  %v1077_v42 = vor.u32 %v1076_v12, %v1075_v11  ;;  %v1085_v48 = vrot.slane %v3457_v26, 2  ;;  %v1089_v50 = vrot.slane %v3484_v31, 1  ;;  %v2811_v12 = vld [vmem:[#allocation3 + $0x128] sm:$0xff]  }
 0x1a2   : > { %v1082_v46 = vor.u32 %v1081_v29, %v1080_v36  ;;  %v1090_v51 = vrot.slane %v3464_v4, 2  ;;  %v1030_v6 = vsel %vm316_vm2, %v1025_v43, %v1029_v21  ;;  %v1061_v0 = vsel %vm373_vm1, %v1059_v14, %v1060_v28  ;;  %v2813_v29 = vld [vmem:[#allocation3 + $0x1a8] sm:$0xff]   ;;  %v2814_v28 = vld [vmem:[#allocation3 + $0x160] sm:$0xff]  }
 0x1a3   : > { %v2650_v52 = vpop.f32.mrf.mxu0  ;;  %v1018_v56 = vsel %vm316_vm2, %v1013_v37, %v1017_v34  ;;  %v1086_v3 = vor.u32 %v1085_v48, %v1084_v45  ;;  %v1064_v37 = vsel %vm373_vm1, %v1062_v15, %v1063_v18  ;;  %v2831_v15 = vld [vmem:[#allocation3 + $0x108] sm:$0xff]  }
 0x1a4   : > { %v738_v58 = vadd.f32 %v2650_v52, %v3426_v54  ;;  %1827 = vmatprep.mubr.bf16.mxu1 %v1018_v56  ;;  %v1083_v8 = vsel %vm394_vm3, %v1077_v42, %v1082_v46  ;;  %v1091_v1 = vor.u32 %v1090_v51, %v1089_v50  ;;  %v2816_v42 = vld [vmem:[#allocation3 + $0x1e0] sm:$0xff]  }
 0x1a5   : > { %v729_v17 = vpop.f32.mrf.mxu0  ;;  %1828 = vmatmul.mubr.bf16.vlgmr.msra.gmra.mxu1 %v3454_v24  ;;  %1892 = vmatprep.mubr.bf16.mxu0 %v1083_v8  ;;  %v2815_v46 = vld [vmem:[#allocation3 + $0x120] sm:$0xff]  }
 0x1a6   : > { %v750_v38 = vmax.f32 %v738_v58, 0.0  ;;  %v730_v5 = vadd.f32 %v3426_v54, %v729_v17  ;;  %1835 = vmatprep.mubr.bf16.mxu1 %v1030_v6  ;;  %1893 = vmatmul.mubr.bf16.vlgmr.msra.gmra.mxu0 %v1061_v0  ;;  %v1092_v7 = vsel %vm394_vm3, %v1086_v3, %v1091_v1  ;;  %v2817_v56 = vld [vmem:[#allocation3 + $0x1a0] sm:$0xff]   ;;  %v2824_v58 = vld [vmem:[#allocation3 + $0x1d8] sm:$0xff]   ;;  %v2826_v17 = vld [vmem:[#allocation3 + $0x150] sm:$0xff]  }
 0x1a7   : > { %v2651_v61 = vpop.f32.mrf.mxu0  ;;  %1900 = vmatprep.mubr.bf16.mxu0 %v1092_v7  ;;  %2547 = vmatpush3.bf16.msra.mxu1 %v2803_v57  ;;  %v2820_v57 = vld [vmem:[#allocation3 + $0x158] sm:$0xff]   ;;  %v2828_v6 = vld [vmem:[#allocation3 + $0x1d0] sm:$0xff]  }
 0x1a8   : > { %v2419_v40 = vpack.c.bf16 %v750_v38, %v750_v38  ;;  %v748_v63 = vmax.f32 %v730_v5, 0.0  ;;  %v741_v35 = vadd.f32 %v2651_v61, %v3426_v54  ;;  %2587 = vmatpush3.bf16.msra.mxu0 %v2805_v59  ;;  %2548 = vmatprep.subr.bf16.mxu1 %v2806_v60  ;;  %v2821_v1 = vld [vmem:[#allocation3 + $0x118] sm:$0xff]   ;;  %v2323_v59 = vcombine.low %v3443_v19, %v3451_v23  ;;  %v2827_v0 = vld [vmem:[#allocation3 + $0x110] sm:$0xff]   ;;  %v2830_v5 = vld [vmem:[#allocation3 + $0x148] sm:$0xff]  }
 0x1a9   : > { %v732_v10 = vpop.f32.mrf.mxu0  ;;  %2588 = vmatprep.subr.bf16.mxu0 %v2808_v2  ;;  %v2825_v60 = vld [vmem:[#allocation3 + $0x198] sm:$0xff]   ;;  %v2829_v2 = vld [vmem:[#allocation3 + $0x190] sm:$0xff]  }
 0x1aa   : > { %v802_v16 = vrot.slane %v2419_v40, 6  ;;  %v2417_v14 = vpack.c.bf16 %v748_v63, %v748_v63  ;;  %v751_v33 = vmax.f32 %v741_v35, 0.0  ;;  %v733_v11 = vadd.f32 %v3426_v54, %v732_v10 }
 0x1ab   : > { %2549 = vmatpush3.bf16.msra.mxu1 %v2807_v62  ;;  %v2832_v62 = vld [vmem:[#allocation3 + $0x1c8] sm:$0xff]  }
 0x1ac   : > { %828 = vst [vmem:[#allocation2 + $0x24] sm:$0xc] %v802_v16  ;;  %v797_v21 = vrot.slane %v2417_v14, 6  ;;  %v2420_v34 = vpack.c.bf16 %v751_v33, %v751_v33  ;;  %v749_v36 = vmax.f32 %v733_v11, 0.0  ;;  %2589 = vmatpush3.bf16.msra.mxu0 %v2809_v41  ;;  %2550 = vmatprep.subr.bf16.mxu1 %v2810_v49  ;;  %v803_v43 = vrot.slane %v802_v16, 4  ;;  %v2833_v16 = vld [vmem:[#allocation3 + $0x188] sm:$0xff]  }
 0x1ad   : > { %1836 = vmatmul.mubr.bf16.gmra.mxu1 %v3441_v47  ;;  %2590 = vmatprep.subr.bf16.mxu0 %v2812_v53  ;;  %v2834_v14 = vld [vmem:[#allocation3 + $0x140] sm:$0xff]  }
 0x1ae   : > { %825 = vst [vmem:[#allocation2 + $0x18] sm:$0xc] %v797_v21  ;;  %v804_v45 = vrot.slane %v2420_v34, 6  ;;  %v2418_v54 = vpack.c.bf16 %v749_v36, %v749_v36  ;;  %1901 = vmatmul.mubr.bf16.gmra.mxu0 %v1064_v37  ;;  %v798_v48 = vrot.slane %v797_v21, 4  ;;  %v2836_v34 = vld [vmem:[#allocation3 + $0x1c0] sm:$0xff]  }
 0x1af   : > { %2551 = vmatpush3.bf16.msra.mxu1 %v2811_v12 }
 0x1b0   : > { %v805_v50 = vsel %vm3388_vm10, %v803_v43, %v804_v45  ;;  %v806_v51 = vrot.slane %v804_v45, 4  ;;  %v799_v52 = vrot.slane %v2418_v54, 6  ;;  %2591 = vmatpush3.bf16.msra.mxu0 %v2813_v29  ;;  %2552 = vmatprep.subr.bf16.mxu1 %v2814_v28 }
 0x1b1   : > { %829 = vst [vmem:[#allocation2 + $0x28] sm:$0xf] %v805_v50  ;;  %2592 = vmatprep.subr.bf16.mxu0 %v2816_v42 }
 0x1b2   : > { %830 = vst [vmem:[#allocation2 + $0x2c] sm:$0x3] %v806_v51  ;;  %v800_v8 = vsel %vm3388_vm10, %v798_v48, %v799_v52  ;;  %v801_v3 = vrot.slane %v799_v52, 4 }
 0x1b3   : > { %826 = vst [vmem:[#allocation2 + $0x1c] sm:$0xf] %v800_v8  ;;  %2553 = vmatpush3.bf16.msra.mxu1 %v2815_v46  ;;  %v968_v38 = vld [vmem:[#allocation2 + $0x24] sm:$0xf]  ;;  %v2835_v46 = vld [vmem:[#allocation3 + $0x100] sm:$0xff]  }
 0x1b4   : > { %827 = vst [vmem:[#allocation2 + $0x20] sm:$0x3] %v801_v3  ;;  %2593 = vmatpush3.bf16.msra.mxu0 %v2817_v56  ;;  %2554 = vmatprep.subr.bf16.mxu1 %v2820_v57  ;;  %v2837_v56 = vld [vmem:[#allocation3 + $0x180] sm:$0xff]  }
 0x1b5   : > { %2594 = vmatprep.subr.bf16.mxu0 %v2824_v58  ;;  %v965_v40 = vld [vmem:[#allocation2 + $0x18] sm:$0xf] }
 0x1b7   : > { %2555 = vmatpush3.bf16.msra.mxu1 %v2821_v1 }
 0x1b8   : > { %v3520_v55 = vld [vmem:[#allocation2 + $0x28] sm:$0xf]  ;;  %2595 = vmatpush3.bf16.msra.mxu0 %v2825_v60  ;;  %2556 = vmatprep.subr.bf16.mxu1 %v2826_v17 }
 0x1b9   : > { %v3522_v7 = vld [vmem:[#allocation2 + $0x2c] sm:$0xf]  ;;  %v3525_v61 = vcombine.low %v968_v38, %v3520_v55  ;;  %2596 = vmatprep.subr.bf16.mxu0 %v2828_v6  ;;  %v1132_v38 = vrot.slane %v3470_v25, 3 }
 0x1ba   : > { %v3527_v63 = vld [vmem:[#allocation2 + $0x1c] sm:$0xf]  ;;  %v3531_v35 = vcombine.low %v3522_v7, %v3522_v7 }
 0x1bb   : > { %v3533_v41 = vld [vmem:[#allocation2 + $0x20] sm:$0xf]  ;;  %v3536_v49 = vcombine.low %v965_v40, %v3527_v63  ;;  %v3539_v10 = vshll.u32 %v3525_v61, 16  ;;  %2557 = vmatpush3.bf16.msra.mxu1 %v2827_v0  ;;  %v3555_v12 = vshrl.u32 %v3525_v61, 16 }
 0x1bc   : > { %v3543_v18 = vcombine.low %v3533_v41, %v3533_v41  ;;  %v3546_v53 = vshll.u32 %v3531_v35, 16  ;;  %2597 = vmatpush3.bf16.msra.mxu0 %v2829_v2  ;;  %2558 = vmatprep.subr.bf16.mxu1 %v2830_v5  ;;  %v3566_v37 = vshrl.u32 %v3531_v35, 16  ;;  %v1131_v2 = vrot.slane %v3467_v32, 2  ;;  %v2838_v5 = vld [vmem:[#allocation3 + $0x238] sm:$0xff]  }
 0x1bd   : > { %v3549_v33 = vshrl.u32 %v3536_v49, 16  ;;  %v3552_v11 = vshll.u32 %v3536_v49, 16  ;;  %v1048_v21 = vrot.slane %v3539_v10, 1  ;;  %2598 = vmatprep.subr.bf16.mxu0 %v2832_v62  ;;  %v1065_v28 = vrot.slane %v3536_v49, 1 }
 0x1be   : > { %v3559_v36 = vshll.u32 %v3543_v18, 16  ;;  %v3562_v29 = vshrl.u32 %v3543_v18, 16  ;;  %v1053_v54 = vrot.slane %v3546_v53, 1  ;;  %v1066_v52 = vrot.slane %v3543_v18, 1 }
 0x1bf   : > { %v1036_v42 = vrot.slane %v3552_v11, 1  ;;  %v1093_v43 = vrot.slane %v3549_v33, 1  ;;  %v1094_v45 = vrot.slane %v3552_v11, 2  ;;  %2559 = vmatpush3.bf16.msra.mxu1 %v2831_v15  ;;  %v1049_v8 = vor.u32 %v1048_v21, %v3555_v12 }
 0x1c0   : > { %v1041_v48 = vrot.slane %v3559_v36, 1  ;;  %v1098_v50 = vrot.slane %v3562_v29, 1  ;;  %v1099_v51 = vrot.slane %v3559_v36, 2  ;;  %2599 = vmatpush3.bf16.msra.mxu0 %v2833_v16  ;;  %2560 = vmatprep.subr.bf16.mxu1 %v2834_v14  ;;  %v1102_v3 = vrot.slane %v3555_v12, 1 }
 0x1c1   : > { %v1037_v57 = vor.u32 %v1036_v42, %v3549_v33  ;;  %v1095_v58 = vor.u32 %v1094_v45, %v1093_v43  ;;  %2600 = vmatprep.subr.bf16.mxu0 %v2836_v34  ;;  %v1103_v60 = vrot.slane %v3539_v10, 2  ;;  %v1107_v17 = vrot.slane %v3566_v37, 1 }
 0x1c2   : > { %v1100_v1 = vor.u32 %v1099_v51, %v1098_v50  ;;  %v1108_v6 = vrot.slane %v3546_v53, 2  ;;  %v1134_v16 = vrot.slane %v3480_v13, 2  ;;  %v1054_v14 = vsel %vm316_vm2, %v1049_v8, %v1053_v54 }
 0x1c3   : > { %v1042_v0 = vsel %vm316_vm2, %v1037_v57, %v1041_v48  ;;  %2561 = vmatpush3.bf16.msra.mxu1 %v2835_v46  ;;  %v1104_v40 = vor.u32 %v1103_v60, %v1102_v3  ;;  %v1067_v21 = vsel %vm373_vm1, %v1065_v28, %v1066_v52  ;;  %v1135_v34 = vrot.slane %v3477_v20, 3 }
 0x1c4   : > { %1843 = vmatprep.mubr.bf16.mxu1 %v1042_v0  ;;  %v1101_v62 = vsel %vm394_vm3, %v1095_v58, %v1100_v1  ;;  %v1109_v15 = vor.u32 %v1108_v6, %v1107_v17  ;;  %2601 = vmatpush3.bf16.msra.mxu0 %v2837_v56  ;;  %v1179_v42 = vrot.slane %v3467_v32, 3  ;;  %v1180_v45 = vrot.slane %v3470_v25, 4 }
 0x1c5   : > { %1844 = vmatmul.mubr.bf16.gmra.mxu1 %v3536_v49  ;;  %1908 = vmatprep.mubr.bf16.mxu0 %v1101_v62  ;;  %v1182_v46 = vrot.slane %v3480_v13, 3  ;;  %v1183_v48 = vrot.slane %v3477_v20, 4  ;;  %v1068_v54 = vrot.slane %v3525_v61, 1  ;;  %v1069_v28 = vrot.slane %v3531_v35, 1 }
 0x1c6   : > { %1851 = vmatprep.mubr.bf16.mxu1 %v1054_v14  ;;  %1909 = vmatmul.mubr.bf16.gmra.mxu0 %v1067_v21  ;;  %v1110_v43 = vsel %vm394_vm3, %v1104_v40, %v1109_v15  ;;  %v1133_v50 = vor.u32 %v1132_v38, %v1131_v2  ;;  %v1136_v51 = vor.u32 %v1135_v34, %v1134_v16  ;;  %v1138_v56 = vrot.slane %v3473_v27, 2  ;;  %v2839_v14 = vld [vmem:[#allocation3 + $0x230] sm:$0xff]  }
 0x1c7   : > { %1916 = vmatprep.mubr.bf16.mxu0 %v1110_v43  ;;  %2662 = vmatprep.subr.bf16.mxu1 %v2838_v5  ;;  %v1181_v52 = vor.u32 %v1180_v45, %v1179_v42  ;;  %v1184_v32 = vor.u32 %v1183_v48, %v1182_v46  ;;  %v1139_v57 = vrot.slane %v3457_v26, 3  ;;  %v1141_v25 = vrot.slane %v3484_v31, 2  ;;  %v2840_v48 = vld [vmem:[#allocation3 + $0x228] sm:$0xff]  }
 0x1c8   : > { %v1142_v13 = vrot.slane %v3464_v4, 3  ;;  %v1070_v20 = vsel %vm373_vm1, %v1068_v54, %v1069_v28  ;;  %v1137_v58 = vsel %vm460_vm4, %v1133_v50, %v1136_v51  ;;  %v1115_v3 = vrot.slane %v3454_v24, 2 }
 0x1c9   : > { %v1185_v8 = vsel %vm518_vm6, %v1181_v52, %v1184_v32  ;;  %v1116_v1 = vrot.slane %v3461_v30, 2  ;;  %v1186_v60 = vrot.slane %v3473_v27, 3  ;;  %v1187_v17 = vrot.slane %v3457_v26, 4 }
 0x1ca   : > { %v1189_v6 = vrot.slane %v3484_v31, 3  ;;  %v1190_v0 = vrot.slane %v3464_v4, 4  ;;  %v1140_v2 = vor.u32 %v1139_v57, %v1138_v56  ;;  %v1143_v38 = vor.u32 %v1142_v13, %v1141_v25 }
 0x1cb   : > { %v1163_v62 = vrot.slane %v3454_v24, 3  ;;  %v1164_v40 = vrot.slane %v3461_v30, 3  ;;  %v1188_v15 = vor.u32 %v1187_v17, %v1186_v60  ;;  %v1117_v21 = vsel %vm439_vm0, %v1115_v3, %v1116_v1 }
 0x1cc   : > { %v1191_v16 = vor.u32 %v1190_v0, %v1189_v6  ;;  %v1144_v34 = vsel %vm460_vm4, %v1140_v2, %v1143_v38  ;;  %vm3830_vm1 = vcmask 1044480   ;;  %v1145_v26 = vrot.slane %v3549_v33, 2 }
 0x1cd   : > { %1852 = vmatmul.mubr.bf16.gmra.mxu1 %v3525_v61  ;;  %v1165_v27 = vsel %vm3830_vm1, %v1163_v62, %v1164_v40  ;;  %v1146_v4 = vrot.slane %v3552_v11, 3  ;;  %v1148_v31 = vrot.slane %v3562_v29, 2  ;;  %v1149_v24 = vrot.slane %v3559_v36, 3  ;;  %vm3831_vm2 = vmmov %vm3830_vm1 }
 0x1ce   : > { %1917 = vmatmul.mubr.bf16.gmra.mxu0 %v1070_v20  ;;  %1957 = vmatprep.mubr.bf16.mxu1 %v1137_v58  ;;  %v1193_v30 = vrot.slane %v3549_v33, 3  ;;  %v1194_v42 = vrot.slane %v3552_v11, 4  ;;  %v1196_v43 = vrot.slane %v3562_v29, 3  ;;  %v1197_v45 = vrot.slane %v3559_v36, 4  ;;  %v2841_v36 = vld [vmem:[#allocation3 + $0x220] sm:$0xff]   ;;  %v2842_v20 = vld [vmem:[#allocation3 + $0x218] sm:$0xff]   ;;  %vm3832_vm3 = vmmov %vm3830_vm1 }
 0x1cf   : > { %2022 = vmatprep.mubr.bf16.mxu0 %v1185_v8  ;;  %v1192_v46 = vsel %vm518_vm6, %v1188_v15, %v1191_v16  ;;  %v1118_v54 = vrot.slane %v3441_v47, 2  ;;  %v1119_v28 = vrot.slane %v3447_v9, 2  ;;  %v1150_v50 = vor.u32 %v1149_v24, %v1148_v31 }
 0x1d0   : > { %v1166_v33 = vrot.slane %v3441_v47, 3  ;;  %v1167_v11 = vrot.slane %v3447_v9, 3  ;;  %v1195_v29 = vor.u32 %v1194_v42, %v1193_v30  ;;  %v1198_v51 = vor.u32 %v1197_v45, %v1196_v43 }
 0x1d1   : > { %v1120_v52 = vsel %vm439_vm0, %v1118_v54, %v1119_v28  ;;  %v1152_v32 = vrot.slane %v3555_v12, 2  ;;  %v1153_v57 = vrot.slane %v3539_v10, 3  ;;  %v1155_v25 = vrot.slane %v3566_v37, 2 }
 0x1d2   : > { %v1156_v13 = vrot.slane %v3546_v53, 3  ;;  %v1168_v47 = vsel %vm3831_vm2, %v1166_v33, %v1167_v11  ;;  %v1199_v9 = vsel %vm518_vm6, %v1195_v29, %v1198_v51  ;;  %v1200_v58 = vrot.slane %v3555_v12, 3 }
 0x1d3   : > { %v1201_v8 = vrot.slane %v3539_v10, 4  ;;  %v1203_v3 = vrot.slane %v3566_v37, 3  ;;  %v1204_v1 = vrot.slane %v3546_v53, 4  ;;  %v1121_v60 = vrot.slane %v3536_v49, 2  ;;  %v2843_v10 = vld [vmem:[#allocation3 + $0x210] sm:$0xff]  }
 0x1d4   : > { %v1122_v17 = vrot.slane %v3543_v18, 2  ;;  %v1154_v6 = vor.u32 %v1153_v57, %v1152_v32  ;;  %v1157_v0 = vor.u32 %v1156_v13, %v1155_v25  ;;  %v1169_v2 = vrot.slane %v3536_v49, 3  ;;  %v2844_v49 = vld [vmem:[#allocation3 + $0x208] sm:$0xff]  }
 0x1d5   : > { %1958 = vmatmul.mubr.bf16.vlgmr.msra.gmra.mxu1 %v1117_v21  ;;  %v1170_v38 = vrot.slane %v3543_v18, 3  ;;  %v1202_v12 = vor.u32 %v1201_v8, %v1200_v58  ;;  %v1205_v62 = vor.u32 %v1204_v1, %v1203_v3  ;;  %v1124_v18 = vrot.slane %v3525_v61, 2 }
 0x1d6   : > { %2663 = vmatpush3.bf16.msra.mxu1 %v2838_v5  ;;  %1965 = vmatprep.mubr.bf16.mxu1 %v1144_v34  ;;  %v1147_v5 = vor.u32 %v1146_v4, %v1145_v26  ;;  %v1123_v37 = vsel %vm439_vm0, %v1121_v60, %v1122_v17  ;;  %v1158_v53 = vsel %vm460_vm4, %v1154_v6, %v1157_v0  ;;  %v1125_v16 = vrot.slane %v3531_v35, 2  ;;  %v2845_v34 = vld [vmem:[#allocation3 + $0x200] sm:$0xff]   ;;  %v3666_v4 = vpop.f32.mrf.mxu1 }
 0x1d7   : > { %2023 = vmatmul.mubr.bf16.vlgmr.msra.gmra.mxu0 %v1165_v27  ;;  %2664 = vmatprep.subr.bf16.mxu1 %v2839_v14  ;;  %v1171_v40 = vsel %vm3832_vm3, %v1169_v2, %v1170_v38  ;;  %v1206_v15 = vsel %vm518_vm6, %v1202_v12, %v1205_v62  ;;  %v1173_v21 = vrot.slane %v3531_v35, 3  ;;  %v2326_v35 = vcombine.low %v3520_v55, %v3522_v7 }
 0x1d8   : > { %2030 = vmatprep.mubr.bf16.mxu0 %v1192_v46  ;;  %v1151_v56 = vsel %vm460_vm4, %v1147_v5, %v1150_v50  ;;  %v1126_v27 = vsel %vm439_vm0, %v1124_v18, %v1125_v16  ;;  %vm3833_vm4 = vmmov %vm3830_vm1  ;;  %v3668_v31 = vpop.f32.mrf.mxu1 }
 0x1da   : > { %2665 = vmatpush3.bf16.msra.mxu1 %v2839_v14  ;;  %v1172_v14 = vrot.slane %v3525_v61, 3  ;;  %v2325_v61 = vcombine.low %v3527_v63, %v3533_v41  ;;  %v3670_v19 = vpop.f32.mrf.mxu1 }
 0x1db   : > { %2666 = vmatprep.subr.bf16.mxu1 %v2840_v48  ;;  %3834 = vst [vmem:[#allocation9_spill] sm:$0xff] %v3670_v19 }
 0x1dc   : > { %v1174_v26 = vsel %vm3833_vm4, %v1172_v14, %v1173_v21  ;;  %v3672_v23 = vpop.f32.mrf.mxu1 }
 0x1dd   : > { %1966 = vmatmul.mubr.bf16.gmra.mxu1 %v1120_v52  ;;  %3835 = vst [vmem:[#allocation10_spill] sm:$0xff] %v3672_v23 }
 0x1de   : > { %2667 = vmatpush3.bf16.msra.mxu1 %v2840_v48  ;;  %1973 = vmatprep.mubr.bf16.mxu1 %v1151_v56 }
 0x1df   : > { %2031 = vmatmul.mubr.bf16.gmra.mxu0 %v1168_v47  ;;  %2668 = vmatprep.subr.bf16.mxu1 %v2841_v36 }
 0x1e0   : > { %2038 = vmatprep.mubr.bf16.mxu0 %v1199_v9 }
 0x1e2   : > { %2669 = vmatpush3.bf16.msra.mxu1 %v2841_v36 }
 0x1e3   : > { %2670 = vmatprep.subr.bf16.mxu1 %v2842_v20 }
 0x1e5   : > { %1974 = vmatmul.mubr.bf16.gmra.mxu1 %v1123_v37 }
 0x1e6   : > { %2671 = vmatpush3.bf16.msra.mxu1 %v2842_v20  ;;  %1981 = vmatprep.mubr.bf16.mxu1 %v1158_v53 }
 0x1e7   : > { %2039 = vmatmul.mubr.bf16.gmra.mxu0 %v1171_v40  ;;  %2672 = vmatprep.subr.bf16.mxu1 %v2843_v10 }
 0x1e8   : > { %2046 = vmatprep.mubr.bf16.mxu0 %v1206_v15 }
 0x1ea   : > { %2673 = vmatpush3.bf16.msra.mxu1 %v2843_v10 }
 0x1eb   : > { %2674 = vmatprep.subr.bf16.mxu1 %v2844_v49 }
 0x1ed   : > { %1982 = vmatmul.mubr.bf16.gmra.mxu1 %v1126_v27 }
 0x1ee   : > { %2675 = vmatpush3.bf16.msra.mxu1 %v2844_v49  ;;  %2678 = vmatprep.mubr.bf16.mxu1 %v2323_v59  ;;  %v3674_v59 = vpop.f32.mrf.mxu1 }
 0x1ef   : > { %2047 = vmatmul.mubr.bf16.gmra.mxu0 %v1174_v26  ;;  %2676 = vmatprep.subr.bf16.mxu1 %v2845_v34  ;;  %3836 = vst [vmem:[#allocation11_spill] sm:$0xff] %v3674_v59 }
 0x1f0   : > { %v3676_v63 = vpop.f32.mrf.mxu1 }
 0x1f1   : > { %3837 = vst [vmem:[#allocation12_spill] sm:$0xff] %v3676_v63 }
 0x1f2   : > { %2677 = vmatpush3.bf16.msra.mxu1 %v2845_v34  ;;  %v3678_v41 = vpop.f32.mrf.mxu1 }
 0x1f3   : > { %3838 = vst [vmem:[#allocation13_spill] sm:$0xff] %v3678_v41 }
 0x1f4   : > { %v3680_v44 = vpop.f32.mrf.mxu1 }
 0x1f5   : > { %2679 = vmatmul.mubr.bf16.vlgmr.msra.gmra.mxu1 %v2324_v22  ;;  %3839 = vst [vmem:[#allocation14_spill] sm:$0xff] %v3680_v44 }
 0x1f6   : > { %2682 = vmatprep.mubr.bf16.mxu1 %v2325_v61 }
 0x1fd   : > { %2683 = vmatmul.mubr.bf16.gmra.mxu1 %v2326_v35 }
 0x265   : > { %v2482_v39 = vpop.f32.mrf.mxu1 }
 0x266   : > { %v2522_v22 = vpop.f32.mrf.mxu0 }
 0x267   : > { %v2483_v55 = vpop.f32.mrf.mxu1 }
 0x268   : > { %v2523_v7 = vpop.f32.mrf.mxu0  ;;  %v2484_v41 = vadd.f32 %v2483_v55, %v2482_v39 }
 0x269   : > { %v3682_v24 = vpop.f32.mrf.mxu1  ;;  %v2524_v63 = vadd.f32 %v2523_v7, %v2522_v22 }
 0x26a   : > { %v3684_v30 = vpop.f32.mrf.mxu0 }
 0x26b   : > { %v2486_v42 = vpop.f32.mrf.mxu1  ;;  %v1895_v22 = vadd.f32 %v2524_v63, %v2484_v41 }
 0x26c   : > { %v2526_v43 = vpop.f32.mrf.mxu0 }
 0x26d   : > { %v2488_v45 = vpop.f32.mrf.mxu1 }
 0x26e   : > { %v2528_v46 = vpop.f32.mrf.mxu0 }
 0x26f   : > { %v2489_v48 = vpop.f32.mrf.mxu1 }
 0x270   : > { %v2529_v54 = vpop.f32.mrf.mxu0  ;;  %v2490_v26 = vadd.f32 %v2489_v48, %v2488_v45  ;;  %v2487_v45 = vadd.f32 %v2486_v42, %v3682_v24 }
 0x271   : > { %v2491_v28 = vpop.f32.mrf.mxu1  ;;  %v2530_v61 = vadd.f32 %v2529_v54, %v2528_v46  ;;  %v2527_v46 = vadd.f32 %v2526_v43, %v3684_v30 }
 0x272   : > { %v2531_v5 = vpop.f32.mrf.mxu0 }
 0x273   : > { %v2492_v50 = vpop.f32.mrf.mxu1  ;;  %v1898_v30 = vadd.f32 %v2527_v46, %v2487_v45 }
 0x274   : > { %v2532_v33 = vpop.f32.mrf.mxu0 }
 0x285   : > { %v3686_v11 = vpop.f32.mrf.mxu1 }
 0x286   : > { %v3688_v29 = vpop.f32.mrf.mxu0 }
 0x287   : > { %v3690_v51 = vpop.f32.mrf.mxu1 }
 0x288   : > { %v3692_v36 = vpop.f32.mrf.mxu0 }
 0x289   : > { %v3694_v52 = vpop.f32.mrf.mxu1  ;;  %v2536_v63 = vadd.f32 %v3692_v36, %v3688_v29 }
 0x28a   : > { %v3696_v32 = vpop.f32.mrf.mxu0 }
 0x28b   : > { %3840 = vst [vmem:[#allocation15_spill] sm:$0xff] %v3696_v32  ;;  %v3698_v56 = vpop.f32.mrf.mxu1  ;;  %v2533_v32 = vadd.f32 %v2532_v33, %v2531_v5 }
 0x28c   : > { %v3700_v57 = vpop.f32.mrf.mxu0 }
 0x28d   : > { %3841 = vst [vmem:[#allocation16_spill] sm:$0xff] %v3700_v57  ;;  %v2500_v25 = vpop.f32.mrf.mxu1  ;;  %v1903_v57 = vadd.f32 %v2530_v61, %v2490_v26 }
 0x28e   : > { %v2540_v13 = vpop.f32.mrf.mxu0 }
 0x28f   : > { %v2501_v47 = vpop.f32.mrf.mxu1 }
 0x290   : > { %v2541_v9 = vpop.f32.mrf.mxu0 }
 0x291   : > { %v3702_v20 = vpop.f32.mrf.mxu1 }
 0x292   : > { %v3704_v58 = vpop.f32.mrf.mxu0 }
 0x293   : > { %v3706_v8 = vpop.f32.mrf.mxu1 }
 0x294   : > { %v3708_v3 = vpop.f32.mrf.mxu0 }
 0x295   : > { %v2562_v1 = vpop.f32.mrf.mxu1 }
 0x297   : > { %v2602_v60 = vpop.f32.mrf.mxu0  ;;  %v2563_v17 = vpop.f32.mrf.mxu1 }
 0x299   : > { %v2603_v6 = vpop.f32.mrf.mxu0  ;;  %v2565_v0 = vpop.f32.mrf.mxu1 }
 0x29b   : > { %v3710_v2 = vpop.f32.mrf.mxu0  ;;  %v2566_v38 = vpop.f32.mrf.mxu1 }
 0x29c   : > { %v2567_v33 = vadd.f32 %v2566_v38, %v2565_v0 }
 0x29d   : > { %v2606_v12 = vpop.f32.mrf.mxu0  ;;  %v2568_v62 = vpop.f32.mrf.mxu1 }
 0x29f   : > { %v2608_v10 = vpop.f32.mrf.mxu0  ;;  %v2569_v37 = vpop.f32.mrf.mxu1 }
 0x2a0   : > { %v2570_v59 = vadd.f32 %v2569_v37, %v2568_v62  ;;  %v2502_v37 = vadd.f32 %v2501_v47, %v2500_v25 }
 0x2a1   : > { %v2609_v53 = vpop.f32.mrf.mxu0  ;;  %v2571_v40 = vpop.f32.mrf.mxu1 }
 0x2a2   : > { %v1968_v55 = vadd.f32 %v2570_v59, %v1903_v57  ;;  %v2610_v7 = vadd.f32 %v2609_v53, %v2608_v10  ;;  %v2496_v59 = vadd.f32 %v3690_v51, %v3686_v11  ;;  %v2607_v11 = vadd.f32 %v2606_v12, %v3710_v2 }
 0x2a3   : > { %v2611_v15 = vpop.f32.mrf.mxu0  ;;  %v2572_v49 = vpop.f32.mrf.mxu1 }
 0x2a4   : > { %v2573_v54 = vadd.f32 %v2572_v49, %v2571_v40  ;;  %v2033_v25 = vadd.f32 %v2610_v7, %v1968_v55  ;;  %v1911_v36 = vadd.f32 %v2536_v63, %v2496_v59  ;;  %v3856_v59 = vld [vmem:[#allocation11_spill] sm:$0xff] }
 0x2a5   : > { %v2612_v18 = vpop.f32.mrf.mxu0  ;;  %v2574_v16 = vpop.f32.mrf.mxu1 }
 0x2a6   : > { %v2613_v42 = vadd.f32 %v2612_v18, %v2611_v15 }
 0x2a7   : > { %v3712_v14 = vpop.f32.mrf.mxu0  ;;  %v2575_v21 = vpop.f32.mrf.mxu1 }
 0x2a8   : > { %3842 = vst [vmem:[#allocation17_spill] sm:$0xff] %v3712_v14  ;;  %v3725_v14 = vld [vmem:[%s3822_s5] ss:$0 sm:$0xff]  ;;  %v2576_v47 = vadd.f32 %v2575_v21, %v2574_v16 }
 0x2a9   : > { %v3714_v34 = vpop.f32.mrf.mxu0  ;;  %v3716_v27 = vpop.f32.mrf.mxu1  ;;  %v937_v62 = vadd.f32 %v3666_v4, %v3725_v14  ;;  %v929_v24 = vadd.f32 %v3725_v14, %v3668_v31  ;;  %v2545_v31 = vadd.f32 %v3708_v3, %v3704_v58  ;;  %v953_v63 = vadd.f32 %v3856_v59, %v3725_v14 }
 0x2aa   : > { %3843 = vst [vmem:[#allocation18_spill] sm:$0xff] %v3714_v34  ;;  %3844 = vst [vmem:[#allocation19_spill] sm:$0xff] %v3716_v27  ;;  %v2493_v34 = vadd.f32 %v2492_v50, %v2491_v28  ;;  %v2564_v27 = vadd.f32 %v2563_v17, %v2562_v1  ;;  %v2604_v50 = vadd.f32 %v2603_v6, %v2602_v60  ;;  %v3847_v60 = vld [vmem:[#allocation15_spill] sm:$0xff] }
 0x2ab   : > { %v3718_v35 = vpop.f32.mrf.mxu0  ;;  %v2578_v44 = vpop.f32.mrf.mxu1  ;;  %v1963_v1 = vadd.f32 %v2567_v33, %v1898_v30  ;;  %v1976_v2 = vadd.f32 %v2576_v47, %v1911_v36  ;;  %v3859_v36 = vld [vmem:[#allocation14_spill] sm:$0xff] }
 0x2ac   : > { %3845 = vst [vmem:[#allocation20_spill] sm:$0xff] %v3718_v35  ;;  %v1906_v28 = vadd.f32 %v2533_v32, %v2493_v34  ;;  %v1960_v5 = vadd.f32 %v2564_v27, %v1895_v22  ;;  %v3853_v27 = vld [vmem:[#allocation10_spill] sm:$0xff] }
 0x2ad   : > { %v3720_v23 = vpop.f32.mrf.mxu0  ;;  %v2580_v19 = vpop.f32.mrf.mxu1  ;;  %v2028_v34 = vadd.f32 %v2607_v11, %v1963_v1  ;;  %v932_v61 = vadd.f32 %v3725_v14, %v3853_v27 }
 0x2ae   : > { %3846 = vst [vmem:[#allocation21_spill] sm:$0xff] %v3720_v23  ;;  %v2542_v23 = vadd.f32 %v2541_v9, %v2540_v13  ;;  %v1971_v4 = vadd.f32 %v2573_v54, %v1906_v28  ;;  %v2505_v13 = vadd.f32 %v3706_v8, %v3702_v20  ;;  %v2025_v29 = vadd.f32 %v2604_v50, %v1960_v5 }
 0x2af   : > { %v2620_v48 = vpop.f32.mrf.mxu0  ;;  %v2581_v39 = vpop.f32.mrf.mxu1  ;;  %v3849_v12 = vld [vmem:[#allocation17_spill] sm:$0xff] }
 0x2b0   : > { %v2582_v43 = vadd.f32 %v2581_v39, %v2580_v19  ;;  %v1919_v32 = vadd.f32 %v2542_v23, %v2502_v37  ;;  %v2499_v19 = vadd.f32 %v3698_v56, %v3694_v52  ;;  %v3848_v23 = vld [vmem:[#allocation16_spill] sm:$0xff]  ;;  %v2036_v38 = vadd.f32 %v2613_v42, %v1971_v4  ;;  %v3852_v56 = vld [vmem:[#allocation9_spill] sm:$0xff] }
 0x2b1   : > { %v2621_v35 = vpop.f32.mrf.mxu0  ;;  %v2583_v26 = vpop.f32.mrf.mxu1  ;;  %v2539_v17 = vadd.f32 %v3848_v23, %v3847_v60  ;;  %v1922_v10 = vadd.f32 %v2545_v31, %v2505_v13  ;;  %v3850_v53 = vld [vmem:[#allocation18_spill] sm:$0xff]  ;;  %v3851_v15 = vld [vmem:[#allocation19_spill] sm:$0xff]  ;;  %v940_v18 = vadd.f32 %v3852_v56, %v3725_v14  ;;  %v3858_v13 = vld [vmem:[#allocation13_spill] sm:$0xff] }
 0x2b2   : > { %v1984_v8 = vadd.f32 %v2582_v43, %v1919_v32  ;;  %v2622_v0 = vadd.f32 %v2621_v35, %v2620_v48  ;;  %v2616_v40 = vadd.f32 %v3850_v53, %v3849_v12  ;;  %v2579_v49 = vadd.f32 %v2578_v44, %v3851_v15 }
 0x2b3   : > { %v2584_v41 = vpop.f32.mrf.mxu1  ;;  %v2623_v57 = vpop.f32.mrf.mxu0  ;;  %v1914_v35 = vadd.f32 %v2539_v17, %v2499_v19  ;;  %v3854_v54 = vld [vmem:[#allocation20_spill] sm:$0xff]  ;;  %v956_v31 = vadd.f32 %v3858_v13, %v3725_v14  ;;  %v948_v19 = vadd.f32 %v3725_v14, %v3859_v36 }
 0x2b4   : > { %v2585_v6 = vadd.f32 %v2584_v41, %v2583_v26  ;;  %v2049_v55 = vadd.f32 %v2622_v0, %v1984_v8  ;;  %v2041_v28 = vadd.f32 %v2616_v40, %v1976_v2 }
 0x2b5   : > { %v2680_v9 = vpop.f32.mrf.mxu1  ;;  %v2624_v58 = vpop.f32.mrf.mxu0  ;;  %v1979_v7 = vadd.f32 %v2579_v49, %v1914_v35  ;;  %v3855_v37 = vld [vmem:[#allocation21_spill] sm:$0xff] }
 0x2b6   : > { %v2098_v51 = vadd.f32 %v2680_v9, %v2033_v25  ;;  %v1987_v45 = vadd.f32 %v2585_v6, %v1922_v10  ;;  %v2625_v46 = vadd.f32 %v2624_v58, %v2623_v57  ;;  %v2619_v26 = vadd.f32 %v3855_v37, %v3854_v54  ;;  %v3857_v25 = vld [vmem:[#allocation12_spill] sm:$0xff] }
 0x2b7   : > { %v2089_v20 = vpop.f32.mrf.mxu1  ;;  %v945_v32 = vadd.f32 %v3725_v14, %v3857_v25 }
 0x2b8   : > { %v2090_v3 = vadd.f32 %v2089_v20, %v2025_v29  ;;  %v2122_v16 = vadd.f32 %v2098_v51, %v937_v62  ;;  %v2044_v51 = vadd.f32 %v2619_v26, %v1979_v7 }
 0x2b9   : > { %v2681_v52 = vpop.f32.mrf.mxu1 }
 0x2ba   : > { %v2101_v21 = vadd.f32 %v2681_v52, %v2036_v38  ;;  %v2120_v39 = vadd.f32 %v2090_v3, %v929_v24  ;;  %v2130_v5 = vmax.f32 %v2122_v16, 0.0  ;;  %v2052_v24 = vadd.f32 %v2625_v46, %v1987_v45 }
 0x2bb   : > { %v2092_v48 = vpop.f32.mrf.mxu1 }
 0x2bc   : > { %v2123_v22 = vadd.f32 %v2101_v21, %v940_v18  ;;  %v2093_v44 = vadd.f32 %v2092_v48, %v2028_v34  ;;  %v2128_v4 = vmax.f32 %v2120_v39, 0.0 }
 0x2bd   : > { %v2684_v62 = vpop.f32.mrf.mxu1 }
 0x2be   : > { %v2131_v50 = vmax.f32 %v2123_v22, 0.0  ;;  %v2121_v33 = vadd.f32 %v2093_v44, %v932_v61  ;;  %v2114_v30 = vadd.f32 %v2684_v62, %v2049_v55 }
 0x2bf   : > { %v2105_v41 = vpop.f32.mrf.mxu1 }
 0x2c0   : > { %v2439_v42 = vpack.c.bf16 %v2131_v50, %v2130_v5  ;;  %v2129_v43 = vmax.f32 %v2121_v33, 0.0  ;;  %v2106_v57 = vadd.f32 %v2105_v41, %v2041_v28  ;;  %v2126_v1 = vadd.f32 %v2114_v30, %v953_v63 }
 0x2c1   : > { %v2685_v47 = vpop.f32.mrf.mxu1 }
 0x2c2   : > { %2451 = vst [vmem:[%s262_s15 + $0x8] sm:$0xff] %v2439_v42   ;;  %v2434_v9 = vpack.c.bf16 %v2129_v43, %v2128_v4  ;;  %v2117_v11 = vadd.f32 %v2685_v47, %v2052_v24  ;;  %v2124_v60 = vadd.f32 %v2106_v57, %v945_v32  ;;  %v2134_v6 = vmax.f32 %v2126_v1, 0.0 }
 0x2c3   : > { %v2108_v29 = vpop.f32.mrf.mxu1 }
 0x2c4   : > { %2435 = vst [vmem:[%s262_s15] sm:$0xff] %v2434_v9   ;;  %v2127_v23 = vadd.f32 %v2117_v11, %v956_v31  ;;  %v2109_v17 = vadd.f32 %v2108_v29, %v2044_v51  ;;  %v2132_v0 = vmax.f32 %v2124_v60, 0.0 }
 0x2c6   : > { %v2135_v20 = vmax.f32 %v2127_v23, 0.0  ;;  %v2125_v8 = vadd.f32 %v2109_v17, %v948_v19 }
 0x2c8   : > { %v2449_v58 = vpack.c.bf16 %v2135_v20, %v2134_v6  ;;  %v2133_v3 = vmax.f32 %v2125_v8, 0.0 }
 0x2ca   : > { %2453 = vst [vmem:[%s262_s15 + $0x18] sm:$0xff] %v2449_v58   ;;  %v2444_v14 = vpack.c.bf16 %v2133_v3, %v2132_v0 }
 0x2cc   : > { %2452 = vst [vmem:[%s262_s15 + $0x10] sm:$0xff] %v2444_v14  }
 0x2cd   : > { %2888 = shalt.err (!%p2885_p0)
}
 0x2ce   : > { %s2889_s11 = scalar_lea.hbm %s3772_s20, 512  ;;  %s2893_s14 = scalar_lea.hbm %s3823_s6, 1024 }
 0x2cf   : > { %p2890_p1 = scmp.ne.s32.totalorder %s3772_s20, %s2889_s11  ;;  %p2894_p4 = scmp.lt.s32.totalorder %s3772_s20, %s3823_s6 }
 0x2d0   : > { %p2895_p7 = scmp.lt.s32.totalorder %s2893_s14, %s2889_s11 }
 0x2d1   : > { %p2891_p2 = pnand %p2890_p1, %p3028_p5 }
 0x2d2   : > { %p2896_p8 = por %p2895_p7, %p2894_p4 }
 0x2d3   : > { %p2892_p3 = pneg %p2891_p2 }
 0x2d5   : > { %p2897_p6 = pnand %p2896_p8, %p2892_p3 }
 0x2d7   : > { %2900 = shalt.err (!%p2897_p6)
}
 0x2d8   : > { %s2954_s18 = smov 64  }
 0x2d9   : > { %2693 = dma.vmem_to_hbm [thread:$0]  (%p3028_p5), %s3767_s16, 512, %s3772_s20, %s3776_s26, %s2954_s18, %s2954_s18, %s2946_s9  }
 0x2da PF: > { %p2705_p9 = scmp.ge.s32.totalorder %s2939_s24, 2  ;;  %s2206_s19 = sand.u32 1, %s2927_s21  }
 0x2db   : > { %p3860_p10 = scmp.ne.s32.totalorder %s3826_s8, 0  ;;  %s2207_s25 = scalar_lea.sflag [#allocation5], %s2206_s19 }
 0x2dd   : > { %p2700_p11 = pnand %p2705_p9, %p3860_p10 }
 0x2df   : > { %p2701_p12 = pneg %p2700_p11 }
 0x2e1   : > { %2922 = dma.done.wait (%p2701_p12), %s2207_s25, 512  }
 0x2e2   : > { %2924 = vsyncadd (%p2701_p12), %s2207_s25, 4294966784  ;;  %p17_p13 = scmp.ge.s32.totalorder %s3015_s27, 4   ;;  %s3861_s21 = smov %s2931_s22 }
 0x2e3   : > { %s3862_s22 = smov %s2935_s23  ;;  %s3863_s23 = smov %s3026_s30 }
 0x2e4   : > { %s3864_s24 = smov %s3015_s27  ;;  %19 = sbr.rel (!%p17_p13) target bundleno = 4 (0x4), region = 84 }
 0x2e9   :  { %2212 = vsyncpa [#allocation4], 1 }
 0x2ea   :  { %2214 = vsyncpa [#allocation4 + $0x1], 1 }
 0x2eb   :  { %2215 = vsyncpa [#allocation5], 1 }
 0x2ec   :  { %2217 = vsyncpa [#allocation5 + $0x1], 1 }

</bundles_post_ra>
